<compile_context>
chip_gen: v6e
topology: v6e:2x2x1
jax: 0.10.0
libtpu: 0.0.40
codegen_flags: <defaults>
</compile_context>

<pallas_src>
import functools
import math

import jax
import jax.numpy as jnp
from jax.experimental import pallas as pl
from jax.experimental.pallas import tpu as pltpu


def _leaky_relu(v, slope=0.2):
    return jnp.where(v > 0, v, slope * v)


def _sigmoid(v):
    # Numerically stable split form (selected branch is always finite).
    return jnp.where(v >= 0,
                     1.0 / (1.0 + jnp.exp(-v)),
                     jnp.exp(v) / (1.0 + jnp.exp(v)))


def _discriminator_kernel(x_ref,
                          w1_ref, b1_ref,
                          w2_ref, b2_ref,
                          w3_ref, b3_ref,
                          w4_ref, b4_ref,
                          out_ref):
    """Fused MLP for one batch tile: (TB, D) -> 512 -> 256 -> 128 -> 1 + Sigmoid."""
    # Layer 1 (MXU: bf16 x bf16 -> f32 accumulate).
    h = jnp.dot(x_ref[...], w1_ref[...], preferred_element_type=jnp.float32)
    h = _leaky_relu(h + b1_ref[...])
    # Layer 2
    h = jnp.dot(h.astype(jnp.bfloat16), w2_ref[...], preferred_element_type=jnp.float32)
    h = _leaky_relu(h + b2_ref[...])
    # Layer 3
    h = jnp.dot(h.astype(jnp.bfloat16), w3_ref[...], preferred_element_type=jnp.float32)
    h = _leaky_relu(h + b3_ref[...])
    # Layer 4 (128 -> 1): VPU multiply + cross-lane reduce; avoids an N=1 MXU pass.
    logits = jnp.sum(h * w4_ref[...], axis=-1, keepdims=True) + b4_ref[...]
    out_ref[...] = _sigmoid(logits).astype(out_ref.dtype)


def init_params(key, input_dim, dtype=jnp.float32):
    """nn.Linear-style init: U(-1/sqrt(fan_in), 1/sqrt(fan_in)).

    Weights stored as (in_features, out_features) (transpose of PyTorch layout)
    so the kernel computes h = x @ W + b directly.
    """
    dims = [input_dim, 512, 256, 128, 1]
    params = []
    for i in range(4):
        fan_in, fan_out = dims[i], dims[i + 1]
        key, kw, kb = jax.random.split(key, 3)
        bound = 1.0 / (fan_in ** 0.5)
        w = jax.random.uniform(kw, (fan_in, fan_out), dtype, -bound, bound)
        b = jax.random.uniform(kb, (1, fan_out), dtype, -bound, bound)
        params.append((w, b))
    return params


def _round_up(n, m):
    return ((n + m - 1) // m) * m


def _default_batch_tile():
    try:
        kind = jax.devices()[0].device_kind.lower()
    except Exception:
        return 256
    # v5e's MXU is 128-wide; v6e/v7x are 256-wide.
    if "v5 lite" in kind or "v5e" in kind or "v5litepod" in kind:
        return 128
    return 256


@functools.partial(jax.jit, static_argnames=("batch_tile",))
def vanilla_discriminator(x, params, *, batch_tile=None):
    """x: (B, C, H, W) float32 (NCHW). Returns squeezed sigmoid scores (PyTorch .squeeze())."""
    if batch_tile is None:
        batch_tile = _default_batch_tile()

    B = x.shape[0]
    D = math.prod(x.shape[1:])
    x2d = x.reshape(B, D)  # flatten, like x.view(x.size(0), -1)

    (w1, b1), (w2, b2), (w3, b3), (w4, b4) = params

    # bf16 inputs/weights into the MXU; f32 biases added to the f32 accumulator.
    xb = x2d.astype(jnp.bfloat16)
    w1b, w2b, w3b = (w.astype(jnp.bfloat16) for w in (w1, w2, w3))
    b1f, b2f, b3f = (b.astype(jnp.float32) for b in (b1, b2, b3))
    # Final 128 -> 1 layer runs on the VPU in f32: weight as a (1, 128) row.
    w4_row = w4.astype(jnp.float32).reshape(1, w4.shape[0])
    b4f = b4.astype(jnp.float32).reshape(1, 1)

    # Pad the batch up to a sublane/tile multiple so every MXU LHS tile is dense.
    B_pad = _round_up(B, 8)
    tb = min(batch_tile, B_pad)
    B_pad = _round_up(B_pad, tb)
    if B_pad != B:
        xb = jnp.pad(xb, ((0, B_pad - B), (0, 0)))

    grid = (B_pad // tb,)

    def resident(shape):
        # Same block every grid step -> weights/biases stay resident in VMEM.
        return pl.BlockSpec(shape, lambda i: (0,) * len(shape))

    out = pl.pallas_call(
        _discriminator_kernel,
        out_shape=jax.ShapeDtypeStruct((B_pad, 1), jnp.float32),
        grid=grid,
        in_specs=[
            pl.BlockSpec((tb, D), lambda i: (i, 0)),  # x: tiled + double-buffered over batch
            resident(w1b.shape), resident(b1f.shape),
            resident(w2b.shape), resident(b2f.shape),
            resident(w3b.shape), resident(b3f.shape),
            resident(w4_row.shape), resident(b4f.shape),
        ],
        out_specs=pl.BlockSpec((tb, 1), lambda i: (i, 0)),
        compiler_params=pltpu.CompilerParams(
            dimension_semantics=("parallel",),   # batch tiles shard across TCs on v7x
            vmem_limit_bytes=32 * 1024 * 1024,   # plenty for resident weights + 2 x-buffers at D=1024
        ),
    )(xb, w1b, b1f, w2b, b2f, w3b, b3f, w4_row, b4f)

    # TODO(synk): for very large input_dim (e.g. D*512 weights near the VMEM budget on v7x),
    # add a K-reduction grid axis for layer 1 with a (tb, 512) f32 scratch accumulator.

    # PyTorch .squeeze() removes all size-1 dims -> (B,) (scalar when B == 1).
    return jnp.squeeze(out[:B])


def _reference(x, params):
    """Pure-JAX reference mirroring the kernel's bf16-input / f32-accumulate precision."""
    (w1, b1), (w2, b2), (w3, b3), (w4, b4) = params
    h = x.reshape(x.shape[0], -1).astype(jnp.bfloat16)
    h = _leaky_relu(jnp.dot(h, w1.astype(jnp.bfloat16),
                            preferred_element_type=jnp.float32) + b1.astype(jnp.float32))
    h = _leaky_relu(jnp.dot(h.astype(jnp.bfloat16), w2.astype(jnp.bfloat16),
                            preferred_element_type=jnp.float32) + b2.astype(jnp.float32))
    h = _leaky_relu(jnp.dot(h.astype(jnp.bfloat16), w3.astype(jnp.bfloat16),
                            preferred_element_type=jnp.float32) + b3.astype(jnp.float32))
    logits = jnp.sum(h * w4.astype(jnp.float32).reshape(1, -1),
                     axis=-1, keepdims=True) + b4.astype(jnp.float32).reshape(1, 1)
    return jnp.squeeze(_sigmoid(logits))


if __name__ == "__main__":
    key = jax.random.PRNGKey(0)
    kx, kp = jax.random.split(key)

    # Small, module-consistent shapes: x is NCHW, input_dim = C*H*W = 4*16*16 = 1024.
    B, C, H, W = 2, 4, 16, 16
    x = jax.random.normal(kx, (B, C, H, W), jnp.float32)

    params = init_params(kp, input_dim=C * H * W)

    out = vanilla_discriminator(x, params)
    out = jax.block_until_ready(out)

    ref = _reference(x, params)
    assert out.shape == ref.shape == (B,), (out.shape, ref.shape)
    assert jnp.allclose(out, ref, atol=1e-3, rtol=1e-3), (out, ref)

    print("KERNEL_OK")
</pallas_src>

<mosaic_0001>
module attributes {stable_mosaic.version = 11 : i64} {
  func.func @_discriminator_kernel(%arg0: i32, %arg1: memref<8x1024xbf16, #tpu.memory_space<vmem>>, %arg2: memref<1024x512xbf16, #tpu.memory_space<vmem>>, %arg3: memref<1x512xf32, #tpu.memory_space<vmem>>, %arg4: memref<512x256xbf16, #tpu.memory_space<vmem>>, %arg5: memref<1x256xf32, #tpu.memory_space<vmem>>, %arg6: memref<256x128xbf16, #tpu.memory_space<vmem>>, %arg7: memref<1x128xf32, #tpu.memory_space<vmem>>, %arg8: memref<1x128xf32, #tpu.memory_space<vmem>>, %arg9: memref<1x1xf32, #tpu.memory_space<vmem>>, %arg10: memref<8x1xf32, #tpu.memory_space<vmem>>) attributes {dimension_semantics = [#tpu.dimension_semantics<parallel>], iteration_bounds = array<i64: 1>, scalar_prefetch = 0 : i64, scratch_operands = 0 : i64, tpu.core_type = #tpu.core_type<tc>, window_params = [{transform_indices = @transform_0, window_bounds = array<i64: 8, 1024>}, {pipeline_mode = #tpu.pipeline_mode<synchronous>, transform_indices = @transform_1, window_bounds = array<i64: 1024, 512>}, {pipeline_mode = #tpu.pipeline_mode<synchronous>, transform_indices = @transform_2, window_bounds = array<i64: 1, 512>}, {pipeline_mode = #tpu.pipeline_mode<synchronous>, transform_indices = @transform_3, window_bounds = array<i64: 512, 256>}, {pipeline_mode = #tpu.pipeline_mode<synchronous>, transform_indices = @transform_4, window_bounds = array<i64: 1, 256>}, {pipeline_mode = #tpu.pipeline_mode<synchronous>, transform_indices = @transform_5, window_bounds = array<i64: 256, 128>}, {pipeline_mode = #tpu.pipeline_mode<synchronous>, transform_indices = @transform_6, window_bounds = array<i64: 1, 128>}, {pipeline_mode = #tpu.pipeline_mode<synchronous>, transform_indices = @transform_7, window_bounds = array<i64: 1, 128>}, {pipeline_mode = #tpu.pipeline_mode<synchronous>, transform_indices = @transform_8, window_bounds = array<i64: 1, 1>}, {transform_indices = @transform_9, window_bounds = array<i64: 8, 1>}]} {
    %c0 = arith.constant 0 : index
    %c0_0 = arith.constant 0 : index
    %0 = vector.load %arg1[%c0, %c0_0] : memref<8x1024xbf16, #tpu.memory_space<vmem>>, vector<8x1024xbf16>
    %c0_1 = arith.constant 0 : index
    %c0_2 = arith.constant 0 : index
    %1 = vector.load %arg2[%c0_1, %c0_2] : memref<1024x512xbf16, #tpu.memory_space<vmem>>, vector<1024x512xbf16>
    %cst = arith.constant dense<0.000000e+00> : vector<8x512xf32>
    %2 = tpu.matmul %0, %1, %cst {dimension_numbers = #tpu.dot_dimension_numbers<[1], [0], [0], [1], [0, 0, 1, 1], [], []>} : vector<8x1024xbf16>, vector<1024x512xbf16>, vector<8x512xf32> -> vector<8x512xf32>
    %c0_3 = arith.constant 0 : index
    %c0_4 = arith.constant 0 : index
    %3 = vector.load %arg3[%c0_3, %c0_4] : memref<1x512xf32, #tpu.memory_space<vmem>>, vector<1x512xf32>
    %4 = vector.broadcast %3 : vector<1x512xf32> to vector<8x512xf32>
    %5 = arith.addf %2, %4 : vector<8x512xf32>
    %cst_5 = arith.constant 0.000000e+00 : f32
    %6 = vector.broadcast %cst_5 : f32 to vector<8x512xf32>
    %7 = arith.cmpf ogt, %5, %6 : vector<8x512xf32>
    %cst_6 = arith.constant 2.000000e-01 : f32
    %8 = vector.broadcast %cst_6 : f32 to vector<8x512xf32>
    %9 = arith.mulf %8, %5 : vector<8x512xf32>
    %10 = arith.select %7, %5, %9 : vector<8x512xi1>, vector<8x512xf32>
    %11 = arith.truncf %10 : vector<8x512xf32> to vector<8x512xbf16>
    %c0_7 = arith.constant 0 : index
    %c0_8 = arith.constant 0 : index
    %12 = vector.load %arg4[%c0_7, %c0_8] : memref<512x256xbf16, #tpu.memory_space<vmem>>, vector<512x256xbf16>
    %cst_9 = arith.constant dense<0.000000e+00> : vector<8x256xf32>
    %13 = tpu.matmul %11, %12, %cst_9 {dimension_numbers = #tpu.dot_dimension_numbers<[1], [0], [0], [1], [0, 0, 1, 1], [], []>} : vector<8x512xbf16>, vector<512x256xbf16>, vector<8x256xf32> -> vector<8x256xf32>
    %c0_10 = arith.constant 0 : index
    %c0_11 = arith.constant 0 : index
    %14 = vector.load %arg5[%c0_10, %c0_11] : memref<1x256xf32, #tpu.memory_space<vmem>>, vector<1x256xf32>
    %15 = vector.broadcast %14 : vector<1x256xf32> to vector<8x256xf32>
    %16 = arith.addf %13, %15 : vector<8x256xf32>
    %cst_12 = arith.constant 0.000000e+00 : f32
    %17 = vector.broadcast %cst_12 : f32 to vector<8x256xf32>
    %18 = arith.cmpf ogt, %16, %17 : vector<8x256xf32>
    %cst_13 = arith.constant 2.000000e-01 : f32
    %19 = vector.broadcast %cst_13 : f32 to vector<8x256xf32>
    %20 = arith.mulf %19, %16 : vector<8x256xf32>
    %21 = arith.select %18, %16, %20 : vector<8x256xi1>, vector<8x256xf32>
    %22 = arith.truncf %21 : vector<8x256xf32> to vector<8x256xbf16>
    %c0_14 = arith.constant 0 : index
    %c0_15 = arith.constant 0 : index
    %23 = vector.load %arg6[%c0_14, %c0_15] : memref<256x128xbf16, #tpu.memory_space<vmem>>, vector<256x128xbf16>
    %cst_16 = arith.constant dense<0.000000e+00> : vector<8x128xf32>
    %24 = tpu.matmul %22, %23, %cst_16 {dimension_numbers = #tpu.dot_dimension_numbers<[1], [0], [0], [1], [0, 0, 1, 1], [], []>} : vector<8x256xbf16>, vector<256x128xbf16>, vector<8x128xf32> -> vector<8x128xf32>
    %c0_17 = arith.constant 0 : index
    %c0_18 = arith.constant 0 : index
    %25 = vector.load %arg7[%c0_17, %c0_18] : memref<1x128xf32, #tpu.memory_space<vmem>>, vector<1x128xf32>
    %26 = vector.broadcast %25 : vector<1x128xf32> to vector<8x128xf32>
    %27 = arith.addf %24, %26 : vector<8x128xf32>
    %cst_19 = arith.constant 0.000000e+00 : f32
    %28 = vector.broadcast %cst_19 : f32 to vector<8x128xf32>
    %29 = arith.cmpf ogt, %27, %28 : vector<8x128xf32>
    %cst_20 = arith.constant 2.000000e-01 : f32
    %30 = vector.broadcast %cst_20 : f32 to vector<8x128xf32>
    %31 = arith.mulf %30, %27 : vector<8x128xf32>
    %32 = arith.select %29, %27, %31 : vector<8x128xi1>, vector<8x128xf32>
    %c0_21 = arith.constant 0 : index
    %c0_22 = arith.constant 0 : index
    %33 = vector.load %arg8[%c0_21, %c0_22] : memref<1x128xf32, #tpu.memory_space<vmem>>, vector<1x128xf32>
    %34 = vector.broadcast %33 : vector<1x128xf32> to vector<8x128xf32>
    %35 = arith.mulf %32, %34 : vector<8x128xf32>
    %cst_23 = arith.constant dense<0.000000e+00> : vector<8xf32>
    %36 = vector.multi_reduction <add>, %35, %cst_23 [1] : vector<8x128xf32> to vector<8xf32>
    %37 = vector.shape_cast %36 : vector<8xf32> to vector<8x1xf32>
    %c0_24 = arith.constant 0 : index
    %c0_25 = arith.constant 0 : index
    %38 = vector.load %arg9[%c0_24, %c0_25] : memref<1x1xf32, #tpu.memory_space<vmem>>, vector<1x1xf32>
    %39 = vector.broadcast %38 : vector<1x1xf32> to vector<8x1xf32>
    %40 = arith.addf %37, %39 : vector<8x1xf32>
    %cst_26 = arith.constant 0.000000e+00 : f32
    %41 = vector.broadcast %cst_26 : f32 to vector<8x1xf32>
    %42 = arith.cmpf oge, %40, %41 : vector<8x1xf32>
    %cst_27 = arith.constant 0.000000e+00 : f32
    %43 = vector.broadcast %cst_27 : f32 to vector<8x1xf32>
    %44 = arith.subf %43, %40 : vector<8x1xf32>
    %45 = math.exp %44 : vector<8x1xf32>
    %cst_28 = arith.constant 1.000000e+00 : f32
    %46 = vector.broadcast %cst_28 : f32 to vector<8x1xf32>
    %47 = arith.addf %46, %45 : vector<8x1xf32>
    %cst_29 = arith.constant 1.000000e+00 : f32
    %48 = vector.broadcast %cst_29 : f32 to vector<8x1xf32>
    %49 = arith.divf %48, %47 : vector<8x1xf32>
    %50 = math.exp %40 : vector<8x1xf32>
    %51 = math.exp %40 : vector<8x1xf32>
    %cst_30 = arith.constant 1.000000e+00 : f32
    %52 = vector.broadcast %cst_30 : f32 to vector<8x1xf32>
    %53 = arith.addf %52, %51 : vector<8x1xf32>
    %54 = arith.divf %50, %53 : vector<8x1xf32>
    %55 = arith.select %42, %49, %54 : vector<8x1xi1>, vector<8x1xf32>
    %c0_31 = arith.constant 0 : index
    %c0_32 = arith.constant 0 : index
    %56 = vector.load %arg10[%c0_31, %c0_32] : memref<8x1xf32, #tpu.memory_space<vmem>>, vector<8x1xf32>
    tpu.vector_store %arg10[%c0_31, %c0_32], %55 {strides = array<i32>} : memref<8x1xf32, #tpu.memory_space<vmem>>, vector<8x1xf32>,
    return
  }
  func.func @transform_0(%arg0: i32) -> (i32, i32) {
    %c0_i32 = arith.constant 0 : i32
    %c0_i32_0 = arith.constant 0 : i32
    return %arg0, %c0_i32 : i32, i32
  }
  func.func @transform_1(%arg0: i32) -> (i32, i32) {
    %c0_i32 = arith.constant 0 : i32
    %c0_i32_0 = arith.constant 0 : i32
    %c0_i32_1 = arith.constant 0 : i32
    return %c0_i32, %c0_i32_0 : i32, i32
  }
  func.func @transform_2(%arg0: i32) -> (i32, i32) {
    %c0_i32 = arith.constant 0 : i32
    %c0_i32_0 = arith.constant 0 : i32
    %c0_i32_1 = arith.constant 0 : i32
    return %c0_i32, %c0_i32_0 : i32, i32
  }
  func.func @transform_3(%arg0: i32) -> (i32, i32) {
    %c0_i32 = arith.constant 0 : i32
    %c0_i32_0 = arith.constant 0 : i32
    %c0_i32_1 = arith.constant 0 : i32
    return %c0_i32, %c0_i32_0 : i32, i32
  }
  func.func @transform_4(%arg0: i32) -> (i32, i32) {
    %c0_i32 = arith.constant 0 : i32
    %c0_i32_0 = arith.constant 0 : i32
    %c0_i32_1 = arith.constant 0 : i32
    return %c0_i32, %c0_i32_0 : i32, i32
  }
  func.func @transform_5(%arg0: i32) -> (i32, i32) {
    %c0_i32 = arith.constant 0 : i32
    %c0_i32_0 = arith.constant 0 : i32
    %c0_i32_1 = arith.constant 0 : i32
    return %c0_i32, %c0_i32_0 : i32, i32
  }
  func.func @transform_6(%arg0: i32) -> (i32, i32) {
    %c0_i32 = arith.constant 0 : i32
    %c0_i32_0 = arith.constant 0 : i32
    %c0_i32_1 = arith.constant 0 : i32
    return %c0_i32, %c0_i32_0 : i32, i32
  }
  func.func @transform_7(%arg0: i32) -> (i32, i32) {
    %c0_i32 = arith.constant 0 : i32
    %c0_i32_0 = arith.constant 0 : i32
    %c0_i32_1 = arith.constant 0 : i32
    return %c0_i32, %c0_i32_0 : i32, i32
  }
  func.func @transform_8(%arg0: i32) -> (i32, i32) {
    %c0_i32 = arith.constant 0 : i32
    %c0_i32_0 = arith.constant 0 : i32
    %c0_i32_1 = arith.constant 0 : i32
    return %c0_i32, %c0_i32_0 : i32, i32
  }
  func.func @transform_9(%arg0: i32) -> (i32, i32) {
    %c0_i32 = arith.constant 0 : i32
    %c0_i32_0 = arith.constant 0 : i32
    return %arg0, %c0_i32 : i32, i32
  }
}

</mosaic_0001>

<bundles_post_ra>
// kernel: vanilla_discriminator.1
= control target key start
LH: loop header
LB: loop body
LE: loop exit
PB: predicated region body
PF: predicated region fallthrough
CT: control target
= control target key end

     0   :  { %vm2664_vm7 = vcmask 7168   ;;  %s4715_s1 = inlined_call_operand.vmem [shape: bf16[1024,512], index: 1, kind: input, shape index: {}]   ;;  %s4716_s0 = inlined_call_operand.vmem [shape: bf16[8,1024], index: 0, kind: input, shape index: {}]   ;;  %s4717_s3 = inlined_call_operand.vmem [shape: bf16[512,256], index: 3, kind: input, shape index: {}]   ;;  %s4718_s2 = inlined_call_operand.vmem [shape: f32[1,512], index: 2, kind: input, shape index: {}]   ;;  %s4719_s5 = inlined_call_operand.vmem [shape: bf16[256,128], index: 5, kind: input, shape index: {}]   ;;  %s4720_s4 = inlined_call_operand.vmem [shape: f32[1,256], index: 4, kind: input, shape index: {}]   ;;  %s4721_s8 = inlined_call_operand.<no memory space> [shape: f32[1,1], index: 8, kind: input, shape index: {}]   ;;  %s4722_s6 = inlined_call_operand.vmem [shape: f32[1,128], index: 6, kind: input, shape index: {}]   ;;  %s4723_s7 = inlined_call_operand.vmem [shape: f32[1,128], index: 7, kind: input, shape index: {}]   ;;  %s4724_s9 = inlined_call_operand.vmem [shape: f32[8,1], index: 9, kind: output, shape index: {}]  }
   0x1   :  { %v3039_v0 = vld [vmem:[%s4715_s1 + $0xe4] ss:$16 sps:$4 sm:$0xff]   ;;  %v3043_v2 = vld [vmem:[%s4715_s1 + $0xe0] ss:$16 sps:$4 sm:$0xff]   ;;  %v36_v48 = vld [vmem:[%s4716_s0 + $0x8] sm:$0xff] }
   0x2   :  { %v3041_v1 = vld [vmem:[%s4715_s1 + $0x2e4] ss:$16 sps:$4 sm:$0xff]   ;;  %1625 = vmatprep.subr.bf16.mxu0 %v3039_v0  ;;  %v3044_v3 = vld [vmem:[%s4715_s1 + $0x2e0] ss:$16 sps:$4 sm:$0xff]   ;;  %v3753_v51 = vcombine.high %v36_v48, %v36_v48 }
   0x3   :  { %1666 = vmatprep.subr.bf16.mxu1 %v3041_v1  ;;  %v3045_v4 = vld [vmem:[%s4715_s1 + $0xc4] ss:$16 sps:$4 sm:$0xff]   ;;  %1626 = vmatpush1.bf16.msra.mxu0 %v3043_v2  ;;  %v3049_v6 = vld [vmem:[%s4715_s1 + $0xc0] ss:$16 sps:$4 sm:$0xff]  }
   0x4   :  { %1667 = vmatpush1.bf16.msra.mxu1 %v3044_v3  ;;  %v3047_v5 = vld [vmem:[%s4715_s1 + $0x2c4] ss:$16 sps:$4 sm:$0xff]   ;;  %1627 = vmatprep.subr.bf16.mxu0 %v3045_v4  ;;  %v3050_v7 = vld [vmem:[%s4715_s1 + $0x2c0] ss:$16 sps:$4 sm:$0xff]  }
   0x5   :  { %1668 = vmatprep.subr.bf16.mxu1 %v3047_v5  ;;  %v3051_v8 = vld [vmem:[%s4715_s1 + $0xa4] ss:$16 sps:$4 sm:$0xff]   ;;  %v3055_v10 = vld [vmem:[%s4715_s1 + $0xa0] ss:$16 sps:$4 sm:$0xff]   ;;  %1698 = vmatprep.mubr.bf16.mxu1 %v3753_v51 }
   0x6   :  { %v3053_v9 = vld [vmem:[%s4715_s1 + $0x2a4] ss:$16 sps:$4 sm:$0xff]   ;;  %v3056_v11 = vld [vmem:[%s4715_s1 + $0x2a0] ss:$16 sps:$4 sm:$0xff]  }
   0x7   :  { %1628 = vmatpush1.bf16.msra.mxu0 %v3049_v6  ;;  %v3057_v12 = vld [vmem:[%s4715_s1 + $0x84] ss:$16 sps:$4 sm:$0xff]   ;;  %v3061_v14 = vld [vmem:[%s4715_s1 + $0x80] ss:$16 sps:$4 sm:$0xff]  }
   0x8   :  { %1669 = vmatpush1.bf16.msra.mxu1 %v3050_v7  ;;  %1629 = vmatprep.subr.bf16.mxu0 %v3051_v8  ;;  %v3059_v13 = vld [vmem:[%s4715_s1 + $0x284] ss:$16 sps:$4 sm:$0xff]   ;;  %v3062_v15 = vld [vmem:[%s4715_s1 + $0x280] ss:$16 sps:$4 sm:$0xff]   ;;  %v3813_v7 = vcombine.low %v36_v48, %v36_v48 }
   0x9   :  { %1670 = vmatprep.subr.bf16.mxu1 %v3053_v9  ;;  %v3063_v16 = vld [vmem:[%s4715_s1 + $0x64] ss:$16 sps:$4 sm:$0xff]   ;;  %v3067_v18 = vld [vmem:[%s4715_s1 + $0x60] ss:$16 sps:$4 sm:$0xff]  }
   0xa   :  { %v3065_v17 = vld [vmem:[%s4715_s1 + $0x264] ss:$16 sps:$4 sm:$0xff]   ;;  %v3068_v19 = vld [vmem:[%s4715_s1 + $0x260] ss:$16 sps:$4 sm:$0xff]  }
   0xb   :  { %1630 = vmatpush1.bf16.msra.mxu0 %v3055_v10  ;;  %v3069_v20 = vld [vmem:[%s4715_s1 + $0x44] ss:$16 sps:$4 sm:$0xff]   ;;  %v3073_v22 = vld [vmem:[%s4715_s1 + $0x40] ss:$16 sps:$4 sm:$0xff]  }
   0xc   :  { %1671 = vmatpush1.bf16.msra.mxu1 %v3056_v11  ;;  %1631 = vmatprep.subr.bf16.mxu0 %v3057_v12  ;;  %v3071_v21 = vld [vmem:[%s4715_s1 + $0x244] ss:$16 sps:$4 sm:$0xff]   ;;  %v3074_v23 = vld [vmem:[%s4715_s1 + $0x240] ss:$16 sps:$4 sm:$0xff]  }
   0xd   :  { %1672 = vmatprep.subr.bf16.mxu1 %v3059_v13  ;;  %v3075_v24 = vld [vmem:[%s4715_s1 + $0x24] ss:$16 sps:$4 sm:$0xff]   ;;  %v3079_v26 = vld [vmem:[%s4715_s1 + $0x20] ss:$16 sps:$4 sm:$0xff]  }
   0xe   :  { %v3077_v25 = vld [vmem:[%s4715_s1 + $0x224] ss:$16 sps:$4 sm:$0xff]   ;;  %v3080_v27 = vld [vmem:[%s4715_s1 + $0x220] ss:$16 sps:$4 sm:$0xff]  }
   0xf   :  { %1632 = vmatpush1.bf16.msra.mxu0 %v3061_v14  ;;  %v3081_v28 = vld [vmem:[%s4715_s1 + $0x4] ss:$16 sps:$4 sm:$0xff]   ;;  %v3085_v30 = vld [vmem:[%s4715_s1] ss:$16 sps:$4 sm:$0xff]  }
  0x10   :  { %1673 = vmatpush1.bf16.msra.mxu1 %v3062_v15  ;;  %1633 = vmatprep.subr.bf16.mxu0 %v3063_v16  ;;  %v3083_v29 = vld [vmem:[%s4715_s1 + $0x204] ss:$16 sps:$4 sm:$0xff]   ;;  %v3086_v31 = vld [vmem:[%s4715_s1 + $0x200] ss:$16 sps:$4 sm:$0xff]  }
  0x11   :  { %1674 = vmatprep.subr.bf16.mxu1 %v3065_v17  ;;  %v3087_v32 = vld [vmem:[%s4715_s1 + $0x1e4] ss:$16 sps:$4 sm:$0xff]   ;;  %v3091_v34 = vld [vmem:[%s4715_s1 + $0x1e0] ss:$16 sps:$4 sm:$0xff]  }
  0x12   :  { %v3089_v33 = vld [vmem:[%s4715_s1 + $0x3e4] ss:$16 sps:$4 sm:$0xff]   ;;  %v3092_v35 = vld [vmem:[%s4715_s1 + $0x3e0] ss:$16 sps:$4 sm:$0xff]  }
  0x13   :  { %1634 = vmatpush1.bf16.msra.mxu0 %v3067_v18  ;;  %v3093_v36 = vld [vmem:[%s4715_s1 + $0x1c4] ss:$16 sps:$4 sm:$0xff]   ;;  %v3097_v38 = vld [vmem:[%s4715_s1 + $0x1c0] ss:$16 sps:$4 sm:$0xff]  }
  0x14   :  { %1675 = vmatpush1.bf16.msra.mxu1 %v3068_v19  ;;  %1635 = vmatprep.subr.bf16.mxu0 %v3069_v20  ;;  %v3095_v37 = vld [vmem:[%s4715_s1 + $0x3c4] ss:$16 sps:$4 sm:$0xff]   ;;  %v3098_v39 = vld [vmem:[%s4715_s1 + $0x3c0] ss:$16 sps:$4 sm:$0xff]  }
  0x15   :  { %1676 = vmatprep.subr.bf16.mxu1 %v3071_v21  ;;  %v3099_v40 = vld [vmem:[%s4715_s1 + $0x1a4] ss:$16 sps:$4 sm:$0xff]   ;;  %v3103_v42 = vld [vmem:[%s4715_s1 + $0x1a0] ss:$16 sps:$4 sm:$0xff]  }
  0x16   :  { %v3101_v41 = vld [vmem:[%s4715_s1 + $0x3a4] ss:$16 sps:$4 sm:$0xff]   ;;  %v3104_v43 = vld [vmem:[%s4715_s1 + $0x3a0] ss:$16 sps:$4 sm:$0xff]  }
  0x17   :  { %1636 = vmatpush1.bf16.msra.mxu0 %v3073_v22  ;;  %v3105_v44 = vld [vmem:[%s4715_s1 + $0x184] ss:$16 sps:$4 sm:$0xff]   ;;  %v3109_v49 = vld [vmem:[%s4715_s1 + $0x180] ss:$16 sps:$4 sm:$0xff]  }
  0x18   :  { %1677 = vmatpush1.bf16.msra.mxu1 %v3074_v23  ;;  %1637 = vmatprep.subr.bf16.mxu0 %v3075_v24  ;;  %v3107_v45 = vld [vmem:[%s4715_s1 + $0x384] ss:$16 sps:$4 sm:$0xff]   ;;  %v3110_v50 = vld [vmem:[%s4715_s1 + $0x380] ss:$16 sps:$4 sm:$0xff]  }
  0x19   :  { %1678 = vmatprep.subr.bf16.mxu1 %v3077_v25  ;;  %v35_v46 = vld [vmem:[%s4716_s0] sm:$0xff] }
  0x1a   :  { %v3742_v47 = vcombine.high %v35_v46, %v35_v46  ;;  %v3111_v52 = vld [vmem:[%s4715_s1 + $0x164] ss:$16 sps:$4 sm:$0xff]   ;;  %v3115_v54 = vld [vmem:[%s4715_s1 + $0x160] ss:$16 sps:$4 sm:$0xff]   ;;  %v3811_v6 = vcombine.low %v35_v46, %v35_v46 }
  0x1b   :  { %1638 = vmatpush1.bf16.msra.mxu0 %v3079_v26  ;;  %v3113_v53 = vld [vmem:[%s4715_s1 + $0x364] ss:$16 sps:$4 sm:$0xff]   ;;  %v3116_v55 = vld [vmem:[%s4715_s1 + $0x360] ss:$16 sps:$4 sm:$0xff]  }
  0x1c   :  { %1679 = vmatpush1.bf16.msra.mxu1 %v3080_v27  ;;  %1639 = vmatprep.subr.bf16.mxu0 %v3081_v28  ;;  %v3117_v56 = vld [vmem:[%s4715_s1 + $0x144] ss:$16 sps:$4 sm:$0xff]   ;;  %v3121_v58 = vld [vmem:[%s4715_s1 + $0x140] ss:$16 sps:$4 sm:$0xff]  }
  0x1d   :  { %1680 = vmatprep.subr.bf16.mxu1 %v3083_v29  ;;  %1657 = vmatprep.mubr.bf16.mxu0 %v3742_v47  ;;  %v3119_v57 = vld [vmem:[%s4715_s1 + $0x344] ss:$16 sps:$4 sm:$0xff]   ;;  %v3122_v59 = vld [vmem:[%s4715_s1 + $0x340] ss:$16 sps:$4 sm:$0xff]  }
  0x1e   :  { %v3123_v60 = vld [vmem:[%s4715_s1 + $0x124] ss:$16 sps:$4 sm:$0xff]   ;;  %v3127_v62 = vld [vmem:[%s4715_s1 + $0x120] ss:$16 sps:$4 sm:$0xff]  }
  0x1f   :  { %1640 = vmatpush1.bf16.msra.mxu0 %v3085_v30  ;;  %v3125_v61 = vld [vmem:[%s4715_s1 + $0x324] ss:$16 sps:$4 sm:$0xff]   ;;  %v3128_v63 = vld [vmem:[%s4715_s1 + $0x320] ss:$16 sps:$4 sm:$0xff]  }
  0x20   :  { %1681 = vmatpush1.bf16.msra.mxu1 %v3086_v31  ;;  %1641 = vmatprep.subr.bf16.mxu0 %v3087_v32  ;;  %v3129_v0 = vld [vmem:[%s4715_s1 + $0x104] ss:$16 sps:$4 sm:$0xff]   ;;  %v3133_v2 = vld [vmem:[%s4715_s1 + $0x100] ss:$16 sps:$4 sm:$0xff]  }
  0x21   :  { %1682 = vmatprep.subr.bf16.mxu1 %v3089_v33  ;;  %v3131_v1 = vld [vmem:[%s4715_s1 + $0x304] ss:$16 sps:$4 sm:$0xff]   ;;  %v3134_v3 = vld [vmem:[%s4715_s1 + $0x300] ss:$16 sps:$4 sm:$0xff]   ;;  %v3897_v33 = vld [vmem:[%s4716_s0 + $0x18] sm:$0xff] }
  0x22   :  { %v3141_v4 = vld [vmem:[%s4715_s1 + $0x4e4] ss:$16 sps:$4 sm:$0xff]   ;;  %v3139_v8 = vld [vmem:[%s4715_s1 + $0x4e0] ss:$16 sps:$4 sm:$0xff]  }
  0x23   :  { %1642 = vmatpush2.bf16.msra.mxu0 %v3091_v34  ;;  %v3144_v5 = vld [vmem:[%s4715_s1 + $0x6e4] ss:$16 sps:$4 sm:$0xff]   ;;  %v3142_v9 = vld [vmem:[%s4715_s1 + $0x6e0] ss:$16 sps:$4 sm:$0xff]  }
  0x24   :  { %1683 = vmatpush2.bf16.msra.mxu1 %v3092_v35  ;;  %1643 = vmatprep.subr.bf16.mxu0 %v3093_v36  ;;  %v3147_v10 = vld [vmem:[%s4715_s1 + $0x4c4] ss:$16 sps:$4 sm:$0xff]   ;;  %v3145_v12 = vld [vmem:[%s4715_s1 + $0x4c0] ss:$16 sps:$4 sm:$0xff]  }
  0x25   :  { %1684 = vmatprep.subr.bf16.mxu1 %v3095_v37  ;;  %v3150_v11 = vld [vmem:[%s4715_s1 + $0x6c4] ss:$16 sps:$4 sm:$0xff]   ;;  %v3148_v13 = vld [vmem:[%s4715_s1 + $0x6c0] ss:$16 sps:$4 sm:$0xff]   ;;  %v3911_v37 = vcombine.high %v3897_v33, %v3897_v33 }
  0x26   :  { %v3153_v14 = vld [vmem:[%s4715_s1 + $0x4a4] ss:$16 sps:$4 sm:$0xff]   ;;  %v3151_v16 = vld [vmem:[%s4715_s1 + $0x4a0] ss:$16 sps:$4 sm:$0xff]  }
  0x27   :  { %1644 = vmatpush2.bf16.msra.mxu0 %v3097_v38  ;;  %v3156_v15 = vld [vmem:[%s4715_s1 + $0x6a4] ss:$16 sps:$4 sm:$0xff]   ;;  %v3154_v17 = vld [vmem:[%s4715_s1 + $0x6a0] ss:$16 sps:$4 sm:$0xff]  }
  0x28   :  { %1685 = vmatpush2.bf16.msra.mxu1 %v3098_v39  ;;  %1645 = vmatprep.subr.bf16.mxu0 %v3099_v40  ;;  %v3159_v18 = vld [vmem:[%s4715_s1 + $0x484] ss:$16 sps:$4 sm:$0xff]   ;;  %v3157_v20 = vld [vmem:[%s4715_s1 + $0x480] ss:$16 sps:$4 sm:$0xff]  }
  0x29   :  { %1686 = vmatprep.subr.bf16.mxu1 %v3101_v41  ;;  %v3162_v19 = vld [vmem:[%s4715_s1 + $0x684] ss:$16 sps:$4 sm:$0xff]   ;;  %v3160_v21 = vld [vmem:[%s4715_s1 + $0x680] ss:$16 sps:$4 sm:$0xff]  }
  0x2a   :  { %v3165_v22 = vld [vmem:[%s4715_s1 + $0x464] ss:$16 sps:$4 sm:$0xff]   ;;  %v3163_v24 = vld [vmem:[%s4715_s1 + $0x460] ss:$16 sps:$4 sm:$0xff]  }
  0x2b   :  { %1646 = vmatpush2.bf16.msra.mxu0 %v3103_v42  ;;  %v3168_v23 = vld [vmem:[%s4715_s1 + $0x664] ss:$16 sps:$4 sm:$0xff]   ;;  %v3166_v25 = vld [vmem:[%s4715_s1 + $0x660] ss:$16 sps:$4 sm:$0xff]  }
  0x2c   :  { %1687 = vmatpush2.bf16.msra.mxu1 %v3104_v43  ;;  %1647 = vmatprep.subr.bf16.mxu0 %v3105_v44  ;;  %v3171_v26 = vld [vmem:[%s4715_s1 + $0x444] ss:$16 sps:$4 sm:$0xff]   ;;  %v3169_v28 = vld [vmem:[%s4715_s1 + $0x440] ss:$16 sps:$4 sm:$0xff]  }
  0x2d   :  { %1688 = vmatprep.subr.bf16.mxu1 %v3107_v45  ;;  %v3174_v27 = vld [vmem:[%s4715_s1 + $0x644] ss:$16 sps:$4 sm:$0xff]   ;;  %v3172_v29 = vld [vmem:[%s4715_s1 + $0x640] ss:$16 sps:$4 sm:$0xff]  }
  0x2e   :  { %v3177_v30 = vld [vmem:[%s4715_s1 + $0x424] ss:$16 sps:$4 sm:$0xff]   ;;  %v3175_v34 = vld [vmem:[%s4715_s1 + $0x420] ss:$16 sps:$4 sm:$0xff]  }
  0x2f   :  { %1648 = vmatpush2.bf16.msra.mxu0 %v3109_v49  ;;  %v3180_v31 = vld [vmem:[%s4715_s1 + $0x624] ss:$16 sps:$4 sm:$0xff]   ;;  %v3178_v35 = vld [vmem:[%s4715_s1 + $0x620] ss:$16 sps:$4 sm:$0xff]  }
  0x30   :  { %1689 = vmatpush2.bf16.msra.mxu1 %v3110_v50  ;;  %1649 = vmatprep.subr.bf16.mxu0 %v3111_v52  ;;  %v3892_v32 = vld [vmem:[%s4716_s0 + $0x10] sm:$0xff] }
  0x31   :  { %1690 = vmatprep.subr.bf16.mxu1 %v3113_v53  ;;  %v3907_v36 = vcombine.high %v3892_v32, %v3892_v32  ;;  %v3183_v38 = vld [vmem:[%s4715_s1 + $0x404] ss:$16 sps:$4 sm:$0xff]   ;;  %v3181_v40 = vld [vmem:[%s4715_s1 + $0x400] ss:$16 sps:$4 sm:$0xff]  }
  0x32   :  { %v3186_v39 = vld [vmem:[%s4715_s1 + $0x604] ss:$16 sps:$4 sm:$0xff]   ;;  %v3184_v41 = vld [vmem:[%s4715_s1 + $0x600] ss:$16 sps:$4 sm:$0xff]  }
  0x33   :  { %1650 = vmatpush2.bf16.msra.mxu0 %v3115_v54  ;;  %v3189_v42 = vld [vmem:[%s4715_s1 + $0x5e4] ss:$16 sps:$4 sm:$0xff]   ;;  %v3187_v44 = vld [vmem:[%s4715_s1 + $0x5e0] ss:$16 sps:$4 sm:$0xff]  }
  0x34   :  { %1691 = vmatpush2.bf16.msra.mxu1 %v3116_v55  ;;  %1651 = vmatprep.subr.bf16.mxu0 %v3117_v56  ;;  %v3192_v43 = vld [vmem:[%s4715_s1 + $0x7e4] ss:$16 sps:$4 sm:$0xff]   ;;  %v3190_v45 = vld [vmem:[%s4715_s1 + $0x7e0] ss:$16 sps:$4 sm:$0xff]  }
  0x35   :  { %1692 = vmatprep.subr.bf16.mxu1 %v3119_v57  ;;  %v3195_v46 = vld [vmem:[%s4715_s1 + $0x5c4] ss:$16 sps:$4 sm:$0xff]   ;;  %v3193_v49 = vld [vmem:[%s4715_s1 + $0x5c0] ss:$16 sps:$4 sm:$0xff]  }
  0x36   :  { %v3198_v48 = vld [vmem:[%s4715_s1 + $0x7c4] ss:$16 sps:$4 sm:$0xff]   ;;  %v3196_v50 = vld [vmem:[%s4715_s1 + $0x7c0] ss:$16 sps:$4 sm:$0xff]  }
  0x37   :  { %1652 = vmatpush2.bf16.msra.mxu0 %v3121_v58  ;;  %v3201_v52 = vld [vmem:[%s4715_s1 + $0x5a4] ss:$16 sps:$4 sm:$0xff]   ;;  %v3199_v54 = vld [vmem:[%s4715_s1 + $0x5a0] ss:$16 sps:$4 sm:$0xff]  }
  0x38   :  { %1693 = vmatpush2.bf16.msra.mxu1 %v3122_v59  ;;  %1653 = vmatprep.subr.bf16.mxu0 %v3123_v60  ;;  %v3204_v53 = vld [vmem:[%s4715_s1 + $0x7a4] ss:$16 sps:$4 sm:$0xff]   ;;  %v3202_v55 = vld [vmem:[%s4715_s1 + $0x7a0] ss:$16 sps:$4 sm:$0xff]  }
  0x39   :  { %1694 = vmatprep.subr.bf16.mxu1 %v3125_v61  ;;  %v3207_v56 = vld [vmem:[%s4715_s1 + $0x584] ss:$16 sps:$4 sm:$0xff]   ;;  %v3205_v58 = vld [vmem:[%s4715_s1 + $0x580] ss:$16 sps:$4 sm:$0xff]  }
  0x3a   :  { %v3210_v57 = vld [vmem:[%s4715_s1 + $0x784] ss:$16 sps:$4 sm:$0xff]   ;;  %v3208_v59 = vld [vmem:[%s4715_s1 + $0x780] ss:$16 sps:$4 sm:$0xff]  }
  0x3b   :  { %1654 = vmatpush2.bf16.msra.mxu0 %v3127_v62  ;;  %v3213_v60 = vld [vmem:[%s4715_s1 + $0x564] ss:$16 sps:$4 sm:$0xff]   ;;  %v3211_v62 = vld [vmem:[%s4715_s1 + $0x560] ss:$16 sps:$4 sm:$0xff]  }
  0x3c   :  { %1695 = vmatpush2.bf16.msra.mxu1 %v3128_v63  ;;  %1655 = vmatprep.subr.bf16.mxu0 %v3129_v0  ;;  %v3216_v61 = vld [vmem:[%s4715_s1 + $0x764] ss:$16 sps:$4 sm:$0xff]   ;;  %v3214_v63 = vld [vmem:[%s4715_s1 + $0x760] ss:$16 sps:$4 sm:$0xff]  }
  0x3d   :  { %1696 = vmatprep.subr.bf16.mxu1 %v3131_v1  ;;  %v3219_v0 = vld [vmem:[%s4715_s1 + $0x544] ss:$16 sps:$4 sm:$0xff]  }
  0x3e   :  { %v3222_v1 = vld [vmem:[%s4715_s1 + $0x744] ss:$16 sps:$4 sm:$0xff]  }
  0x3f   :  { %1656 = vmatpush2.bf16.msra.mxu0 %v3133_v2  ;;  %v3217_v2 = vld [vmem:[%s4715_s1 + $0x540] ss:$16 sps:$4 sm:$0xff]  }
  0x40   :  { %1697 = vmatpush2.bf16.msra.mxu1 %v3134_v3  ;;  %1707 = vmatprep.subr.bf16.mxu0 %v3141_v4  ;;  %v3220_v3 = vld [vmem:[%s4715_s1 + $0x740] ss:$16 sps:$4 sm:$0xff]   ;;  %v3225_v4 = vld [vmem:[%s4715_s1 + $0x524] ss:$16 sps:$4 sm:$0xff]  }
  0x41   :  { %1748 = vmatprep.subr.bf16.mxu1 %v3144_v5  ;;  %v3228_v5 = vld [vmem:[%s4715_s1 + $0x724] ss:$16 sps:$4 sm:$0xff]  }
  0x42   :  { %1658 = vmatmul.mubr.bf16.vlgmr.msra.gmra.mxu0 %v3811_v6 }
  0x43   :  { %1699 = vmatmul.mubr.bf16.vlgmr.msra.gmra.mxu1 %v3813_v7  ;;  %1708 = vmatpush1.bf16.msra.mxu0 %v3139_v8  ;;  %v3223_v8 = vld [vmem:[%s4715_s1 + $0x520] ss:$16 sps:$4 sm:$0xff]  }
  0x44   :  { %1749 = vmatpush1.bf16.msra.mxu1 %v3142_v9  ;;  %1709 = vmatprep.subr.bf16.mxu0 %v3147_v10  ;;  %v3226_v9 = vld [vmem:[%s4715_s1 + $0x720] ss:$16 sps:$4 sm:$0xff]   ;;  %v3231_v10 = vld [vmem:[%s4715_s1 + $0x504] ss:$16 sps:$4 sm:$0xff]  }
  0x45   :  { %1750 = vmatprep.subr.bf16.mxu1 %v3150_v11  ;;  %1739 = vmatprep.mubr.bf16.mxu0 %v3907_v36  ;;  %v3234_v11 = vld [vmem:[%s4715_s1 + $0x704] ss:$16 sps:$4 sm:$0xff]  }
  0x46   :  { %1780 = vmatprep.mubr.bf16.mxu1 %v3911_v37 }
  0x47   :  { %1710 = vmatpush1.bf16.msra.mxu0 %v3145_v12  ;;  %v3229_v12 = vld [vmem:[%s4715_s1 + $0x500] ss:$16 sps:$4 sm:$0xff]  }
  0x48   :  { %1751 = vmatpush1.bf16.msra.mxu1 %v3148_v13  ;;  %1711 = vmatprep.subr.bf16.mxu0 %v3153_v14  ;;  %v3232_v13 = vld [vmem:[%s4715_s1 + $0x700] ss:$16 sps:$4 sm:$0xff]   ;;  %v3241_v14 = vld [vmem:[%s4715_s1 + $0xec] ss:$16 sps:$4 sm:$0xff]  }
  0x49   :  { %1752 = vmatprep.subr.bf16.mxu1 %v3156_v15  ;;  %v3244_v15 = vld [vmem:[%s4715_s1 + $0x2ec] ss:$16 sps:$4 sm:$0xff]  }
  0x4b   :  { %1712 = vmatpush1.bf16.msra.mxu0 %v3151_v16  ;;  %v4031_v16 = vcombine.low %v3892_v32, %v3892_v32  ;;  %v3263_v32 = vld [vmem:[%s4715_s1 + $0x68] ss:$16 sps:$4 sm:$0xff]  }
  0x4c   :  { %1753 = vmatpush1.bf16.msra.mxu1 %v3154_v17  ;;  %1713 = vmatprep.subr.bf16.mxu0 %v3159_v18  ;;  %v4035_v17 = vcombine.low %v3897_v33, %v3897_v33  ;;  %v3239_v18 = vld [vmem:[%s4715_s1 + $0xe8] ss:$16 sps:$4 sm:$0xff]  }
  0x4d   :  { %1754 = vmatprep.subr.bf16.mxu1 %v3162_v19  ;;  %v3242_v19 = vld [vmem:[%s4715_s1 + $0x2e8] ss:$16 sps:$4 sm:$0xff]  }
  0x4e   :  { %v3266_v33 = vld [vmem:[%s4715_s1 + $0x268] ss:$16 sps:$4 sm:$0xff]  }
  0x4f   :  { %1714 = vmatpush1.bf16.msra.mxu0 %v3157_v20  ;;  %v3247_v20 = vld [vmem:[%s4715_s1 + $0xcc] ss:$16 sps:$4 sm:$0xff]  }
  0x50   :  { %1755 = vmatpush1.bf16.msra.mxu1 %v3160_v21  ;;  %1715 = vmatprep.subr.bf16.mxu0 %v3165_v22  ;;  %v3250_v21 = vld [vmem:[%s4715_s1 + $0x2cc] ss:$16 sps:$4 sm:$0xff]   ;;  %v3245_v22 = vld [vmem:[%s4715_s1 + $0xc8] ss:$16 sps:$4 sm:$0xff]  }
  0x51   :  { %1756 = vmatprep.subr.bf16.mxu1 %v3168_v23  ;;  %v3248_v23 = vld [vmem:[%s4715_s1 + $0x2c8] ss:$16 sps:$4 sm:$0xff]  }
  0x53   :  { %1716 = vmatpush1.bf16.msra.mxu0 %v3163_v24  ;;  %v3253_v24 = vld [vmem:[%s4715_s1 + $0xac] ss:$16 sps:$4 sm:$0xff]  }
  0x54   :  { %1757 = vmatpush1.bf16.msra.mxu1 %v3166_v25  ;;  %1717 = vmatprep.subr.bf16.mxu0 %v3171_v26  ;;  %v3256_v25 = vld [vmem:[%s4715_s1 + $0x2ac] ss:$16 sps:$4 sm:$0xff]   ;;  %v3251_v26 = vld [vmem:[%s4715_s1 + $0xa8] ss:$16 sps:$4 sm:$0xff]  }
  0x55   :  { %1758 = vmatprep.subr.bf16.mxu1 %v3174_v27  ;;  %v3254_v27 = vld [vmem:[%s4715_s1 + $0x2a8] ss:$16 sps:$4 sm:$0xff]  }
  0x57   :  { %1718 = vmatpush1.bf16.msra.mxu0 %v3169_v28  ;;  %v3259_v28 = vld [vmem:[%s4715_s1 + $0x8c] ss:$16 sps:$4 sm:$0xff]  }
  0x58   :  { %1759 = vmatpush1.bf16.msra.mxu1 %v3172_v29  ;;  %1719 = vmatprep.subr.bf16.mxu0 %v3177_v30  ;;  %v3260_v29 = vld [vmem:[%s4715_s1 + $0x288] ss:$16 sps:$4 sm:$0xff]   ;;  %v3265_v30 = vld [vmem:[%s4715_s1 + $0x6c] ss:$16 sps:$4 sm:$0xff]  }
  0x59   :  { %1760 = vmatprep.subr.bf16.mxu1 %v3180_v31  ;;  %v3268_v31 = vld [vmem:[%s4715_s1 + $0x26c] ss:$16 sps:$4 sm:$0xff]  }
  0x5b   :  { %1720 = vmatpush1.bf16.msra.mxu0 %v3175_v34  ;;  %v3271_v34 = vld [vmem:[%s4715_s1 + $0x4c] ss:$16 sps:$4 sm:$0xff]  }
  0x5c   :  { %1761 = vmatpush1.bf16.msra.mxu1 %v3178_v35  ;;  %1721 = vmatprep.subr.bf16.mxu0 %v3183_v38  ;;  %v3274_v35 = vld [vmem:[%s4715_s1 + $0x24c] ss:$16 sps:$4 sm:$0xff]   ;;  %v3269_v38 = vld [vmem:[%s4715_s1 + $0x48] ss:$16 sps:$4 sm:$0xff]  }
  0x5d   :  { %1762 = vmatprep.subr.bf16.mxu1 %v3186_v39  ;;  %v3272_v39 = vld [vmem:[%s4715_s1 + $0x248] ss:$16 sps:$4 sm:$0xff]  }
  0x5f   :  { %1722 = vmatpush1.bf16.msra.mxu0 %v3181_v40  ;;  %v3277_v40 = vld [vmem:[%s4715_s1 + $0x2c] ss:$16 sps:$4 sm:$0xff]  }
  0x60   :  { %1763 = vmatpush1.bf16.msra.mxu1 %v3184_v41  ;;  %1723 = vmatprep.subr.bf16.mxu0 %v3189_v42  ;;  %v3280_v41 = vld [vmem:[%s4715_s1 + $0x22c] ss:$16 sps:$4 sm:$0xff]   ;;  %v3275_v42 = vld [vmem:[%s4715_s1 + $0x28] ss:$16 sps:$4 sm:$0xff]  }
  0x61   :  { %1764 = vmatprep.subr.bf16.mxu1 %v3192_v43  ;;  %v3278_v43 = vld [vmem:[%s4715_s1 + $0x228] ss:$16 sps:$4 sm:$0xff]  }
  0x63   :  { %1724 = vmatpush2.bf16.msra.mxu0 %v3187_v44  ;;  %v3283_v44 = vld [vmem:[%s4715_s1 + $0xc] ss:$16 sps:$4 sm:$0xff]  }
  0x64   :  { %1765 = vmatpush2.bf16.msra.mxu1 %v3190_v45  ;;  %1725 = vmatprep.subr.bf16.mxu0 %v3195_v46  ;;  %v3286_v45 = vld [vmem:[%s4715_s1 + $0x20c] ss:$16 sps:$4 sm:$0xff]   ;;  %v3281_v46 = vld [vmem:[%s4715_s1 + $0x8] ss:$16 sps:$4 sm:$0xff]  }
  0x65   :  { %1766 = vmatprep.subr.bf16.mxu1 %v3198_v48  ;;  %v3284_v48 = vld [vmem:[%s4715_s1 + $0x208] ss:$16 sps:$4 sm:$0xff]  }
  0x67   :  { %1726 = vmatpush2.bf16.msra.mxu0 %v3193_v49  ;;  %v3289_v49 = vld [vmem:[%s4715_s1 + $0x1ec] ss:$16 sps:$4 sm:$0xff]  }
  0x68   :  { %1767 = vmatpush2.bf16.msra.mxu1 %v3196_v50  ;;  %1727 = vmatprep.subr.bf16.mxu0 %v3201_v52  ;;  %v3292_v50 = vld [vmem:[%s4715_s1 + $0x3ec] ss:$16 sps:$4 sm:$0xff]   ;;  %v3287_v52 = vld [vmem:[%s4715_s1 + $0x1e8] ss:$16 sps:$4 sm:$0xff]  }
  0x69   :  { %1768 = vmatprep.subr.bf16.mxu1 %v3204_v53  ;;  %v3290_v53 = vld [vmem:[%s4715_s1 + $0x3e8] ss:$16 sps:$4 sm:$0xff]  }
  0x6b   :  { %1728 = vmatpush2.bf16.msra.mxu0 %v3199_v54  ;;  %v3295_v54 = vld [vmem:[%s4715_s1 + $0x1cc] ss:$16 sps:$4 sm:$0xff]  }
  0x6c   :  { %1769 = vmatpush2.bf16.msra.mxu1 %v3202_v55  ;;  %1729 = vmatprep.subr.bf16.mxu0 %v3207_v56  ;;  %v3298_v55 = vld [vmem:[%s4715_s1 + $0x3cc] ss:$16 sps:$4 sm:$0xff]   ;;  %v3293_v56 = vld [vmem:[%s4715_s1 + $0x1c8] ss:$16 sps:$4 sm:$0xff]  }
  0x6d   :  { %1770 = vmatprep.subr.bf16.mxu1 %v3210_v57  ;;  %v3296_v57 = vld [vmem:[%s4715_s1 + $0x3c8] ss:$16 sps:$4 sm:$0xff]  }
  0x6f   :  { %1730 = vmatpush2.bf16.msra.mxu0 %v3205_v58  ;;  %v3301_v58 = vld [vmem:[%s4715_s1 + $0x1ac] ss:$16 sps:$4 sm:$0xff]  }
  0x70   :  { %1771 = vmatpush2.bf16.msra.mxu1 %v3208_v59  ;;  %1731 = vmatprep.subr.bf16.mxu0 %v3213_v60  ;;  %v3304_v59 = vld [vmem:[%s4715_s1 + $0x3ac] ss:$16 sps:$4 sm:$0xff]   ;;  %v3299_v60 = vld [vmem:[%s4715_s1 + $0x1a8] ss:$16 sps:$4 sm:$0xff]  }
  0x71   :  { %1772 = vmatprep.subr.bf16.mxu1 %v3216_v61  ;;  %v3302_v61 = vld [vmem:[%s4715_s1 + $0x3a8] ss:$16 sps:$4 sm:$0xff]  }
  0x73   :  { %1732 = vmatpush2.bf16.msra.mxu0 %v3211_v62  ;;  %v3307_v62 = vld [vmem:[%s4715_s1 + $0x18c] ss:$16 sps:$4 sm:$0xff]  }
  0x74   :  { %1773 = vmatpush2.bf16.msra.mxu1 %v3214_v63  ;;  %1733 = vmatprep.subr.bf16.mxu0 %v3219_v0  ;;  %v3310_v63 = vld [vmem:[%s4715_s1 + $0x38c] ss:$16 sps:$4 sm:$0xff]   ;;  %v3305_v0 = vld [vmem:[%s4715_s1 + $0x188] ss:$16 sps:$4 sm:$0xff]  }
  0x75   :  { %1774 = vmatprep.subr.bf16.mxu1 %v3222_v1  ;;  %v3308_v1 = vld [vmem:[%s4715_s1 + $0x388] ss:$16 sps:$4 sm:$0xff]  }
  0x77   :  { %1734 = vmatpush2.bf16.msra.mxu0 %v3217_v2  ;;  %v3313_v2 = vld [vmem:[%s4715_s1 + $0x16c] ss:$16 sps:$4 sm:$0xff]  }
  0x78   :  { %1775 = vmatpush2.bf16.msra.mxu1 %v3220_v3  ;;  %1735 = vmatprep.subr.bf16.mxu0 %v3225_v4  ;;  %v3316_v3 = vld [vmem:[%s4715_s1 + $0x36c] ss:$16 sps:$4 sm:$0xff]   ;;  %v3311_v4 = vld [vmem:[%s4715_s1 + $0x168] ss:$16 sps:$4 sm:$0xff]  }
  0x79   :  { %1776 = vmatprep.subr.bf16.mxu1 %v3228_v5  ;;  %v3314_v5 = vld [vmem:[%s4715_s1 + $0x368] ss:$16 sps:$4 sm:$0xff]  }
  0x7b   :  { %1736 = vmatpush2.bf16.msra.mxu0 %v3223_v8  ;;  %v3319_v8 = vld [vmem:[%s4715_s1 + $0x14c] ss:$16 sps:$4 sm:$0xff]  }
  0x7c   :  { %1777 = vmatpush2.bf16.msra.mxu1 %v3226_v9  ;;  %1737 = vmatprep.subr.bf16.mxu0 %v3231_v10  ;;  %v3322_v9 = vld [vmem:[%s4715_s1 + $0x34c] ss:$16 sps:$4 sm:$0xff]   ;;  %v3317_v10 = vld [vmem:[%s4715_s1 + $0x148] ss:$16 sps:$4 sm:$0xff]  }
  0x7d   :  { %1778 = vmatprep.subr.bf16.mxu1 %v3234_v11  ;;  %v3320_v11 = vld [vmem:[%s4715_s1 + $0x348] ss:$16 sps:$4 sm:$0xff]  }
  0x7f   :  { %1738 = vmatpush2.bf16.msra.mxu0 %v3229_v12  ;;  %v3325_v12 = vld [vmem:[%s4715_s1 + $0x12c] ss:$16 sps:$4 sm:$0xff]  }
  0x80   :  { %1779 = vmatpush2.bf16.msra.mxu1 %v3232_v13  ;;  %1789 = vmatprep.subr.bf16.mxu0 %v3241_v14  ;;  %v3328_v13 = vld [vmem:[%s4715_s1 + $0x32c] ss:$16 sps:$4 sm:$0xff]   ;;  %v3323_v14 = vld [vmem:[%s4715_s1 + $0x128] ss:$16 sps:$4 sm:$0xff]  }
  0x81   :  { %1830 = vmatprep.subr.bf16.mxu1 %v3244_v15  ;;  %v3326_v15 = vld [vmem:[%s4715_s1 + $0x328] ss:$16 sps:$4 sm:$0xff]  }
  0x82   :  { %1740 = vmatmul.mubr.bf16.vlgmr.msra.gmra.mxu0 %v4031_v16 }
  0x83   :  { %1781 = vmatmul.mubr.bf16.vlgmr.msra.gmra.mxu1 %v4035_v17  ;;  %1790 = vmatpush1.bf16.msra.mxu0 %v3239_v18  ;;  %v3331_v18 = vld [vmem:[%s4715_s1 + $0x10c] ss:$16 sps:$4 sm:$0xff]  }
  0x84   :  { %1831 = vmatpush1.bf16.msra.mxu1 %v3242_v19  ;;  %1791 = vmatprep.subr.bf16.mxu0 %v3247_v20  ;;  %v3334_v19 = vld [vmem:[%s4715_s1 + $0x30c] ss:$16 sps:$4 sm:$0xff]   ;;  %v3329_v20 = vld [vmem:[%s4715_s1 + $0x108] ss:$16 sps:$4 sm:$0xff]  }
  0x85   :  { %1832 = vmatprep.subr.bf16.mxu1 %v3250_v21  ;;  %1821 = vmatprep.mubr.bf16.mxu0 %v3742_v47  ;;  %v3262_v47 = vld [vmem:[%s4715_s1 + $0x28c] ss:$16 sps:$4 sm:$0xff]   ;;  %v3332_v21 = vld [vmem:[%s4715_s1 + $0x308] ss:$16 sps:$4 sm:$0xff]  }
  0x86   :  { %1862 = vmatprep.mubr.bf16.mxu1 %v3753_v51  ;;  %v3257_v51 = vld [vmem:[%s4715_s1 + $0x88] ss:$16 sps:$4 sm:$0xff]  }
  0x87   :  { %1792 = vmatpush1.bf16.msra.mxu0 %v3245_v22  ;;  %v3337_v22 = vld [vmem:[%s4715_s1 + $0x4ec] ss:$16 sps:$4 sm:$0xff]  }
  0x88   :  { %1833 = vmatpush1.bf16.msra.mxu1 %v3248_v23  ;;  %1793 = vmatprep.subr.bf16.mxu0 %v3253_v24  ;;  %v3340_v23 = vld [vmem:[%s4715_s1 + $0x6ec] ss:$16 sps:$4 sm:$0xff]   ;;  %v3335_v24 = vld [vmem:[%s4715_s1 + $0x4e8] ss:$16 sps:$4 sm:$0xff]  }
  0x89   :  { %1834 = vmatprep.subr.bf16.mxu1 %v3256_v25  ;;  %v3338_v25 = vld [vmem:[%s4715_s1 + $0x6e8] ss:$16 sps:$4 sm:$0xff]  }
  0x8b   :  { %1794 = vmatpush1.bf16.msra.mxu0 %v3251_v26  ;;  %v3343_v26 = vld [vmem:[%s4715_s1 + $0x4cc] ss:$16 sps:$4 sm:$0xff]  }
  0x8c   :  { %1835 = vmatpush1.bf16.msra.mxu1 %v3254_v27  ;;  %1795 = vmatprep.subr.bf16.mxu0 %v3259_v28  ;;  %v3346_v27 = vld [vmem:[%s4715_s1 + $0x6cc] ss:$16 sps:$4 sm:$0xff]   ;;  %v3341_v28 = vld [vmem:[%s4715_s1 + $0x4c8] ss:$16 sps:$4 sm:$0xff]  }
  0x8d   :  { %1836 = vmatprep.subr.bf16.mxu1 %v3262_v47  ;;  %v3344_v47 = vld [vmem:[%s4715_s1 + $0x6c8] ss:$16 sps:$4 sm:$0xff]  }
  0x8f   :  { %1796 = vmatpush1.bf16.msra.mxu0 %v3257_v51  ;;  %v3349_v51 = vld [vmem:[%s4715_s1 + $0x4ac] ss:$16 sps:$4 sm:$0xff]  }
  0x90   :  { %1837 = vmatpush1.bf16.msra.mxu1 %v3260_v29  ;;  %1797 = vmatprep.subr.bf16.mxu0 %v3265_v30  ;;  %v3352_v29 = vld [vmem:[%s4715_s1 + $0x6ac] ss:$16 sps:$4 sm:$0xff]   ;;  %v3347_v30 = vld [vmem:[%s4715_s1 + $0x4a8] ss:$16 sps:$4 sm:$0xff]  }
  0x91   :  { %1838 = vmatprep.subr.bf16.mxu1 %v3268_v31  ;;  %v3358_v31 = vld [vmem:[%s4715_s1 + $0x68c] ss:$16 sps:$4 sm:$0xff]  }
  0x93   :  { %1798 = vmatpush1.bf16.msra.mxu0 %v3263_v32  ;;  %v3361_v32 = vld [vmem:[%s4715_s1 + $0x46c] ss:$16 sps:$4 sm:$0xff]  }
  0x94   :  { %1839 = vmatpush1.bf16.msra.mxu1 %v3266_v33  ;;  %1799 = vmatprep.subr.bf16.mxu0 %v3271_v34  ;;  %v3364_v33 = vld [vmem:[%s4715_s1 + $0x66c] ss:$16 sps:$4 sm:$0xff]   ;;  %v3359_v34 = vld [vmem:[%s4715_s1 + $0x468] ss:$16 sps:$4 sm:$0xff]  }
  0x95   :  { %1840 = vmatprep.subr.bf16.mxu1 %v3274_v35  ;;  %v3362_v35 = vld [vmem:[%s4715_s1 + $0x668] ss:$16 sps:$4 sm:$0xff]  }
  0x97   :  { %1800 = vmatpush1.bf16.msra.mxu0 %v3269_v38  ;;  %v3367_v38 = vld [vmem:[%s4715_s1 + $0x44c] ss:$16 sps:$4 sm:$0xff]  }
  0x98   :  { %1841 = vmatpush1.bf16.msra.mxu1 %v3272_v39  ;;  %1801 = vmatprep.subr.bf16.mxu0 %v3277_v40  ;;  %v3370_v39 = vld [vmem:[%s4715_s1 + $0x64c] ss:$16 sps:$4 sm:$0xff]   ;;  %v3365_v40 = vld [vmem:[%s4715_s1 + $0x448] ss:$16 sps:$4 sm:$0xff]  }
  0x99   :  { %1842 = vmatprep.subr.bf16.mxu1 %v3280_v41  ;;  %v3368_v41 = vld [vmem:[%s4715_s1 + $0x648] ss:$16 sps:$4 sm:$0xff]  }
  0x9b   :  { %1802 = vmatpush1.bf16.msra.mxu0 %v3275_v42  ;;  %v3373_v42 = vld [vmem:[%s4715_s1 + $0x42c] ss:$16 sps:$4 sm:$0xff]  }
  0x9c   :  { %1843 = vmatpush1.bf16.msra.mxu1 %v3278_v43  ;;  %1803 = vmatprep.subr.bf16.mxu0 %v3283_v44  ;;  %v3376_v43 = vld [vmem:[%s4715_s1 + $0x62c] ss:$16 sps:$4 sm:$0xff]   ;;  %v3371_v44 = vld [vmem:[%s4715_s1 + $0x428] ss:$16 sps:$4 sm:$0xff]  }
  0x9d   :  { %1844 = vmatprep.subr.bf16.mxu1 %v3286_v45  ;;  %v3374_v45 = vld [vmem:[%s4715_s1 + $0x628] ss:$16 sps:$4 sm:$0xff]  }
  0x9f   :  { %1804 = vmatpush1.bf16.msra.mxu0 %v3281_v46  ;;  %v3379_v46 = vld [vmem:[%s4715_s1 + $0x40c] ss:$16 sps:$4 sm:$0xff]  }
  0xa0   :  { %1845 = vmatpush1.bf16.msra.mxu1 %v3284_v48  ;;  %1805 = vmatprep.subr.bf16.mxu0 %v3289_v49  ;;  %v3382_v48 = vld [vmem:[%s4715_s1 + $0x60c] ss:$16 sps:$4 sm:$0xff]   ;;  %v3377_v49 = vld [vmem:[%s4715_s1 + $0x408] ss:$16 sps:$4 sm:$0xff]  }
  0xa1   :  { %1846 = vmatprep.subr.bf16.mxu1 %v3292_v50  ;;  %v3380_v50 = vld [vmem:[%s4715_s1 + $0x608] ss:$16 sps:$4 sm:$0xff]  }
  0xa3   :  { %1806 = vmatpush2.bf16.msra.mxu0 %v3287_v52  ;;  %v3385_v52 = vld [vmem:[%s4715_s1 + $0x5ec] ss:$16 sps:$4 sm:$0xff]  }
  0xa4   :  { %1847 = vmatpush2.bf16.msra.mxu1 %v3290_v53  ;;  %1807 = vmatprep.subr.bf16.mxu0 %v3295_v54  ;;  %v3388_v53 = vld [vmem:[%s4715_s1 + $0x7ec] ss:$16 sps:$4 sm:$0xff]   ;;  %v3383_v54 = vld [vmem:[%s4715_s1 + $0x5e8] ss:$16 sps:$4 sm:$0xff]  }
  0xa5   :  { %1848 = vmatprep.subr.bf16.mxu1 %v3298_v55  ;;  %v3386_v55 = vld [vmem:[%s4715_s1 + $0x7e8] ss:$16 sps:$4 sm:$0xff]  }
  0xa7   :  { %1808 = vmatpush2.bf16.msra.mxu0 %v3293_v56  ;;  %v3391_v56 = vld [vmem:[%s4715_s1 + $0x5cc] ss:$16 sps:$4 sm:$0xff]  }
  0xa8   :  { %1849 = vmatpush2.bf16.msra.mxu1 %v3296_v57  ;;  %1809 = vmatprep.subr.bf16.mxu0 %v3301_v58  ;;  %v3394_v57 = vld [vmem:[%s4715_s1 + $0x7cc] ss:$16 sps:$4 sm:$0xff]   ;;  %v3389_v58 = vld [vmem:[%s4715_s1 + $0x5c8] ss:$16 sps:$4 sm:$0xff]  }
  0xa9   :  { %1850 = vmatprep.subr.bf16.mxu1 %v3304_v59  ;;  %v3392_v59 = vld [vmem:[%s4715_s1 + $0x7c8] ss:$16 sps:$4 sm:$0xff]  }
  0xab   :  { %1810 = vmatpush2.bf16.msra.mxu0 %v3299_v60  ;;  %v3397_v60 = vld [vmem:[%s4715_s1 + $0x5ac] ss:$16 sps:$4 sm:$0xff]  }
  0xac   :  { %1851 = vmatpush2.bf16.msra.mxu1 %v3302_v61  ;;  %1811 = vmatprep.subr.bf16.mxu0 %v3307_v62  ;;  %v3400_v61 = vld [vmem:[%s4715_s1 + $0x7ac] ss:$16 sps:$4 sm:$0xff]   ;;  %v3395_v62 = vld [vmem:[%s4715_s1 + $0x5a8] ss:$16 sps:$4 sm:$0xff]  }
  0xad   :  { %1852 = vmatprep.subr.bf16.mxu1 %v3310_v63  ;;  %v3398_v63 = vld [vmem:[%s4715_s1 + $0x7a8] ss:$16 sps:$4 sm:$0xff]  }
  0xaf   :  { %1812 = vmatpush2.bf16.msra.mxu0 %v3305_v0  ;;  %v3403_v0 = vld [vmem:[%s4715_s1 + $0x58c] ss:$16 sps:$4 sm:$0xff]  }
  0xb0   :  { %1853 = vmatpush2.bf16.msra.mxu1 %v3308_v1  ;;  %1813 = vmatprep.subr.bf16.mxu0 %v3313_v2  ;;  %v3406_v1 = vld [vmem:[%s4715_s1 + $0x78c] ss:$16 sps:$4 sm:$0xff]   ;;  %v3401_v2 = vld [vmem:[%s4715_s1 + $0x588] ss:$16 sps:$4 sm:$0xff]  }
  0xb1   :  { %1854 = vmatprep.subr.bf16.mxu1 %v3316_v3  ;;  %v3404_v3 = vld [vmem:[%s4715_s1 + $0x788] ss:$16 sps:$4 sm:$0xff]  }
  0xb3   :  { %1814 = vmatpush2.bf16.msra.mxu0 %v3311_v4  ;;  %v3409_v4 = vld [vmem:[%s4715_s1 + $0x56c] ss:$16 sps:$4 sm:$0xff]  }
  0xb4   :  { %1855 = vmatpush2.bf16.msra.mxu1 %v3314_v5  ;;  %1815 = vmatprep.subr.bf16.mxu0 %v3319_v8  ;;  %v3412_v5 = vld [vmem:[%s4715_s1 + $0x76c] ss:$16 sps:$4 sm:$0xff]   ;;  %v3407_v8 = vld [vmem:[%s4715_s1 + $0x568] ss:$16 sps:$4 sm:$0xff]  }
  0xb5   :  { %1856 = vmatprep.subr.bf16.mxu1 %v3322_v9  ;;  %v3410_v9 = vld [vmem:[%s4715_s1 + $0x768] ss:$16 sps:$4 sm:$0xff]  }
  0xb7   :  { %1816 = vmatpush2.bf16.msra.mxu0 %v3317_v10  ;;  %v3415_v10 = vld [vmem:[%s4715_s1 + $0x54c] ss:$16 sps:$4 sm:$0xff]  }
  0xb8   :  { %1857 = vmatpush2.bf16.msra.mxu1 %v3320_v11  ;;  %1817 = vmatprep.subr.bf16.mxu0 %v3325_v12  ;;  %v3418_v11 = vld [vmem:[%s4715_s1 + $0x74c] ss:$16 sps:$4 sm:$0xff]   ;;  %v3413_v12 = vld [vmem:[%s4715_s1 + $0x548] ss:$16 sps:$4 sm:$0xff]  }
  0xb9   :  { %1858 = vmatprep.subr.bf16.mxu1 %v3328_v13  ;;  %v3416_v13 = vld [vmem:[%s4715_s1 + $0x748] ss:$16 sps:$4 sm:$0xff]  }
  0xbb   :  { %1818 = vmatpush2.bf16.msra.mxu0 %v3323_v14  ;;  %v3421_v14 = vld [vmem:[%s4715_s1 + $0x52c] ss:$16 sps:$4 sm:$0xff]  }
  0xbc   :  { %1859 = vmatpush2.bf16.msra.mxu1 %v3326_v15  ;;  %1819 = vmatprep.subr.bf16.mxu0 %v3331_v18  ;;  %v3424_v15 = vld [vmem:[%s4715_s1 + $0x72c] ss:$16 sps:$4 sm:$0xff]   ;;  %v3419_v18 = vld [vmem:[%s4715_s1 + $0x528] ss:$16 sps:$4 sm:$0xff]  }
  0xbd   :  { %1860 = vmatprep.subr.bf16.mxu1 %v3334_v19  ;;  %v3422_v19 = vld [vmem:[%s4715_s1 + $0x728] ss:$16 sps:$4 sm:$0xff]  }
  0xbf   :  { %1820 = vmatpush2.bf16.msra.mxu0 %v3329_v20  ;;  %v3427_v20 = vld [vmem:[%s4715_s1 + $0x50c] ss:$16 sps:$4 sm:$0xff]  }
  0xc0   :  { %1861 = vmatpush2.bf16.msra.mxu1 %v3332_v21  ;;  %1871 = vmatprep.subr.bf16.mxu0 %v3337_v22  ;;  %v3430_v21 = vld [vmem:[%s4715_s1 + $0x70c] ss:$16 sps:$4 sm:$0xff]   ;;  %v3425_v22 = vld [vmem:[%s4715_s1 + $0x508] ss:$16 sps:$4 sm:$0xff]  }
  0xc1   :  { %1912 = vmatprep.subr.bf16.mxu1 %v3340_v23  ;;  %v3428_v23 = vld [vmem:[%s4715_s1 + $0x708] ss:$16 sps:$4 sm:$0xff]  }
  0xc2   :  { %1822 = vmatmul.mubr.bf16.vlgmr.msra.gmra.mxu0 %v3811_v6  ;;  %v3350_v6 = vld [vmem:[%s4715_s1 + $0x6a8] ss:$16 sps:$4 sm:$0xff]  }
  0xc3   :  { %1863 = vmatmul.mubr.bf16.vlgmr.msra.gmra.mxu1 %v3813_v7  ;;  %1872 = vmatpush1.bf16.msra.mxu0 %v3335_v24  ;;  %v3355_v7 = vld [vmem:[%s4715_s1 + $0x48c] ss:$16 sps:$4 sm:$0xff]  }
  0xc4   :  { %1913 = vmatpush1.bf16.msra.mxu1 %v3338_v25  ;;  %1873 = vmatprep.subr.bf16.mxu0 %v3343_v26  ;;  %v3433_v24 = vld [vmem:[%s4717_s3 + $0x74] ss:$8 sps:$4 sm:$0xff]   ;;  %v3431_v25 = vld [vmem:[%s4717_s3 + $0x70] ss:$8 sps:$4 sm:$0xff]   ;;  %v3436_v26 = vld [vmem:[%s4717_s3 + $0x64] ss:$8 sps:$4 sm:$0xff]  }
  0xc5   :  { %1914 = vmatprep.subr.bf16.mxu1 %v3346_v27  ;;  %1903 = vmatprep.mubr.bf16.mxu0 %v3907_v36  ;;  %v3353_v36 = vld [vmem:[%s4715_s1 + $0x488] ss:$16 sps:$4 sm:$0xff]  }
  0xc6   :  { %1944 = vmatprep.mubr.bf16.mxu1 %v3911_v37  ;;  %v3356_v37 = vld [vmem:[%s4715_s1 + $0x688] ss:$16 sps:$4 sm:$0xff]  }
  0xc7   :  { %1874 = vmatpush1.bf16.msra.mxu0 %v3341_v28 }
  0xc8   :  { %1915 = vmatpush1.bf16.msra.mxu1 %v3344_v47  ;;  %1875 = vmatprep.subr.bf16.mxu0 %v3349_v51  ;;  %v3434_v47 = vld [vmem:[%s4717_s3 + $0x60] ss:$8 sps:$4 sm:$0xff]  }
  0xc9   :  { %1916 = vmatprep.subr.bf16.mxu1 %v3352_v29 }
  0xcb   :  { %1876 = vmatpush1.bf16.msra.mxu0 %v3347_v30  ;;  %v3439_v30 = vld [vmem:[%s4717_s3 + $0x54] ss:$8 sps:$4 sm:$0xff]  }
  0xcc   :  { %1917 = vmatpush1.bf16.msra.mxu1 %v3350_v6  ;;  %1877 = vmatprep.subr.bf16.mxu0 %v3355_v7 }
  0xcd   :  { %1918 = vmatprep.subr.bf16.mxu1 %v3358_v31 }
  0xcf   :  { %1878 = vmatpush1.bf16.msra.mxu0 %v3353_v36  ;;  %v3442_v36 = vld [vmem:[%s4717_s3 + $0x44] ss:$8 sps:$4 sm:$0xff]  }
  0xd0   :  { %1919 = vmatpush1.bf16.msra.mxu1 %v3356_v37  ;;  %1879 = vmatprep.subr.bf16.mxu0 %v3361_v32  ;;  %v3479_v37 = vld [vmem:[%s4717_s3 + $0x170] ss:$8 sps:$4 sm:$0xff]   ;;  %v3481_v32 = vld [vmem:[%s4717_s3 + $0x174] ss:$8 sps:$4 sm:$0xff]  }
  0xd1   :  { %1920 = vmatprep.subr.bf16.mxu1 %v3364_v33  ;;  %v3484_v33 = vld [vmem:[%s4717_s3 + $0x164] ss:$8 sps:$4 sm:$0xff]  }
  0xd3   :  { %1880 = vmatpush1.bf16.msra.mxu0 %v3359_v34  ;;  %v3440_v34 = vld [vmem:[%s4717_s3 + $0x40] ss:$8 sps:$4 sm:$0xff]  }
  0xd4   :  { %1921 = vmatpush1.bf16.msra.mxu1 %v3362_v35  ;;  %1881 = vmatprep.subr.bf16.mxu0 %v3367_v38  ;;  %v3482_v35 = vld [vmem:[%s4717_s3 + $0x160] ss:$8 sps:$4 sm:$0xff]   ;;  %v3445_v38 = vld [vmem:[%s4717_s3 + $0x34] ss:$8 sps:$4 sm:$0xff]  }
  0xd5   :  { %1922 = vmatprep.subr.bf16.mxu1 %v3370_v39  ;;  %v3487_v39 = vld [vmem:[%s4717_s3 + $0x154] ss:$8 sps:$4 sm:$0xff]  }
  0xd7   :  { %1882 = vmatpush1.bf16.msra.mxu0 %v3365_v40  ;;  %v3443_v40 = vld [vmem:[%s4717_s3 + $0x30] ss:$8 sps:$4 sm:$0xff]  }
  0xd8   :  { %1923 = vmatpush1.bf16.msra.mxu1 %v3368_v41  ;;  %1883 = vmatprep.subr.bf16.mxu0 %v3373_v42  ;;  %v3485_v41 = vld [vmem:[%s4717_s3 + $0x150] ss:$8 sps:$4 sm:$0xff]   ;;  %v3448_v42 = vld [vmem:[%s4717_s3 + $0x24] ss:$8 sps:$4 sm:$0xff]  }
  0xd9   :  { %1924 = vmatprep.subr.bf16.mxu1 %v3376_v43  ;;  %v3490_v43 = vld [vmem:[%s4717_s3 + $0x144] ss:$8 sps:$4 sm:$0xff]  }
  0xdb   :  { %1884 = vmatpush1.bf16.msra.mxu0 %v3371_v44  ;;  %v3446_v44 = vld [vmem:[%s4717_s3 + $0x20] ss:$8 sps:$4 sm:$0xff]  }
  0xdc   :  { %1925 = vmatpush1.bf16.msra.mxu1 %v3374_v45  ;;  %1885 = vmatprep.subr.bf16.mxu0 %v3379_v46  ;;  %v3488_v45 = vld [vmem:[%s4717_s3 + $0x140] ss:$8 sps:$4 sm:$0xff]   ;;  %v3451_v46 = vld [vmem:[%s4717_s3 + $0x14] ss:$8 sps:$4 sm:$0xff]  }
  0xdd   :  { %1926 = vmatprep.subr.bf16.mxu1 %v3382_v48  ;;  %v3493_v48 = vld [vmem:[%s4717_s3 + $0x134] ss:$8 sps:$4 sm:$0xff]  }
  0xdf   :  { %1886 = vmatpush1.bf16.msra.mxu0 %v3377_v49  ;;  %v3449_v49 = vld [vmem:[%s4717_s3 + $0x10] ss:$8 sps:$4 sm:$0xff]  }
  0xe0   :  { %1927 = vmatpush1.bf16.msra.mxu1 %v3380_v50  ;;  %1887 = vmatprep.subr.bf16.mxu0 %v3385_v52  ;;  %v3491_v50 = vld [vmem:[%s4717_s3 + $0x130] ss:$8 sps:$4 sm:$0xff]   ;;  %v3454_v52 = vld [vmem:[%s4717_s3 + $0x4] ss:$8 sps:$4 sm:$0xff]  }
  0xe1   :  { %1928 = vmatprep.subr.bf16.mxu1 %v3388_v53  ;;  %v3496_v53 = vld [vmem:[%s4717_s3 + $0x124] ss:$8 sps:$4 sm:$0xff]  }
  0xe3   :  { %1888 = vmatpush2.bf16.msra.mxu0 %v3383_v54  ;;  %v3452_v54 = vld [vmem:[%s4717_s3] ss:$8 sps:$4 sm:$0xff]  }
  0xe4   :  { %1929 = vmatpush2.bf16.msra.mxu1 %v3386_v55  ;;  %1889 = vmatprep.subr.bf16.mxu0 %v3391_v56  ;;  %v3494_v55 = vld [vmem:[%s4717_s3 + $0x120] ss:$8 sps:$4 sm:$0xff]   ;;  %v3457_v56 = vld [vmem:[%s4717_s3 + $0xf4] ss:$8 sps:$4 sm:$0xff]  }
  0xe5   :  { %1930 = vmatprep.subr.bf16.mxu1 %v3394_v57  ;;  %v3499_v57 = vld [vmem:[%s4717_s3 + $0x114] ss:$8 sps:$4 sm:$0xff]  }
  0xe7   :  { %1890 = vmatpush2.bf16.msra.mxu0 %v3389_v58  ;;  %v3455_v58 = vld [vmem:[%s4717_s3 + $0xf0] ss:$8 sps:$4 sm:$0xff]  }
  0xe8   :  { %1931 = vmatpush2.bf16.msra.mxu1 %v3392_v59  ;;  %1891 = vmatprep.subr.bf16.mxu0 %v3397_v60  ;;  %v3497_v59 = vld [vmem:[%s4717_s3 + $0x110] ss:$8 sps:$4 sm:$0xff]   ;;  %v3460_v60 = vld [vmem:[%s4717_s3 + $0xe4] ss:$8 sps:$4 sm:$0xff]  }
  0xe9   :  { %1932 = vmatprep.subr.bf16.mxu1 %v3400_v61  ;;  %v3502_v61 = vld [vmem:[%s4717_s3 + $0x104] ss:$8 sps:$4 sm:$0xff]  }
  0xeb   :  { %1892 = vmatpush2.bf16.msra.mxu0 %v3395_v62  ;;  %v3458_v62 = vld [vmem:[%s4717_s3 + $0xe0] ss:$8 sps:$4 sm:$0xff]  }
  0xec   :  { %1933 = vmatpush2.bf16.msra.mxu1 %v3398_v63  ;;  %1893 = vmatprep.subr.bf16.mxu0 %v3403_v0  ;;  %v3500_v63 = vld [vmem:[%s4717_s3 + $0x100] ss:$8 sps:$4 sm:$0xff]   ;;  %v3463_v0 = vld [vmem:[%s4717_s3 + $0xd4] ss:$8 sps:$4 sm:$0xff]  }
  0xed   :  { %1934 = vmatprep.subr.bf16.mxu1 %v3406_v1  ;;  %v3505_v1 = vld [vmem:[%s4717_s3 + $0x1f4] ss:$8 sps:$4 sm:$0xff]  }
  0xef   :  { %1894 = vmatpush2.bf16.msra.mxu0 %v3401_v2  ;;  %v3461_v2 = vld [vmem:[%s4717_s3 + $0xd0] ss:$8 sps:$4 sm:$0xff]  }
  0xf0   :  { %1935 = vmatpush2.bf16.msra.mxu1 %v3404_v3  ;;  %1895 = vmatprep.subr.bf16.mxu0 %v3409_v4  ;;  %v3503_v3 = vld [vmem:[%s4717_s3 + $0x1f0] ss:$8 sps:$4 sm:$0xff]   ;;  %v3466_v4 = vld [vmem:[%s4717_s3 + $0xc4] ss:$8 sps:$4 sm:$0xff]  }
  0xf1   :  { %1936 = vmatprep.subr.bf16.mxu1 %v3412_v5  ;;  %v3508_v5 = vld [vmem:[%s4717_s3 + $0x1e4] ss:$8 sps:$4 sm:$0xff]  }
  0xf3   :  { %1896 = vmatpush2.bf16.msra.mxu0 %v3407_v8  ;;  %v3464_v8 = vld [vmem:[%s4717_s3 + $0xc0] ss:$8 sps:$4 sm:$0xff]  }
  0xf4   :  { %1937 = vmatpush2.bf16.msra.mxu1 %v3410_v9  ;;  %1897 = vmatprep.subr.bf16.mxu0 %v3415_v10  ;;  %v3506_v9 = vld [vmem:[%s4717_s3 + $0x1e0] ss:$8 sps:$4 sm:$0xff]   ;;  %v3469_v10 = vld [vmem:[%s4717_s3 + $0xb4] ss:$8 sps:$4 sm:$0xff]  }
  0xf5   :  { %1938 = vmatprep.subr.bf16.mxu1 %v3418_v11  ;;  %v3511_v11 = vld [vmem:[%s4717_s3 + $0x1d4] ss:$8 sps:$4 sm:$0xff]  }
  0xf7   :  { %1898 = vmatpush2.bf16.msra.mxu0 %v3413_v12  ;;  %v297_v12 = vlaneseq }
  0xf8   :  { %1939 = vmatpush2.bf16.msra.mxu1 %v3416_v13  ;;  %1899 = vmatprep.subr.bf16.mxu0 %v3421_v14  ;;  %v3467_v13 = vld [vmem:[%s4717_s3 + $0xb0] ss:$8 sps:$4 sm:$0xff]  }
  0xf9   :  { %1940 = vmatprep.subr.bf16.mxu1 %v3424_v15  ;;  %v3509_v14 = vld [vmem:[%s4717_s3 + $0x1d0] ss:$8 sps:$4 sm:$0xff]   ;;  %v3472_v15 = vld [vmem:[%s4717_s3 + $0xa4] ss:$8 sps:$4 sm:$0xff]  }
  0xfb   :  { %1900 = vmatpush2.bf16.msra.mxu0 %v3419_v18  ;;  %v3514_v18 = vld [vmem:[%s4717_s3 + $0x1c4] ss:$8 sps:$4 sm:$0xff]  }
  0xfc   :  { %1941 = vmatpush2.bf16.msra.mxu1 %v3422_v19  ;;  %1901 = vmatprep.subr.bf16.mxu0 %v3427_v20  ;;  %v4583_v19 = vshrl.u32 %v297_v12, 7  ;;  %v3470_v20 = vld [vmem:[%s4717_s3 + $0xa0] ss:$8 sps:$4 sm:$0xff]   ;;  %v3536_v12 = vld [vmem:[%s4719_s5 + $0x18] sm:$0xff]  }
  0xfd   :  { %1942 = vmatprep.subr.bf16.mxu1 %v3430_v21  ;;  %v3512_v21 = vld [vmem:[%s4717_s3 + $0x1c0] ss:$8 sps:$4 sm:$0xff]  }
  0xff   :  { %1902 = vmatpush2.bf16.msra.mxu0 %v3425_v22  ;;  %v3475_v22 = vld [vmem:[%s4717_s3 + $0x94] ss:$8 sps:$4 sm:$0xff]  }
 0x100   :  { %1943 = vmatpush2.bf16.msra.mxu1 %v3428_v23  ;;  %2365 = vmatprep.subr.bf16.mxu0 %v3433_v24  ;;  %v3517_v23 = vld [vmem:[%s4717_s3 + $0x1b4] ss:$8 sps:$4 sm:$0xff]   ;;  %v299_v24 = vsub.s32 0, %v4583_v19 }
 0x101   :  { %2406 = vmatprep.subr.bf16.mxu1 %v3481_v32  ;;  %v3520_v32 = vld [vmem:[%s4717_s3 + $0x1a4] ss:$8 sps:$4 sm:$0xff]  }
 0x102   :  { %v4432_v27 = vpop.f32.mrf.mxu0  ;;  %1904 = vmatmul.mubr.bf16.vlgmr.msra.gmra.mxu0 %v4031_v16  ;;  %v3437_v16 = vld [vmem:[%s4717_s3 + $0x50] ss:$8 sps:$4 sm:$0xff]  }
 0x103   :  { %v4434_v28 = vpop.f32.mrf.mxu1  ;;  %1945 = vmatmul.mubr.bf16.vlgmr.msra.gmra.mxu1 %v4035_v17  ;;  %2366 = vmatpush1.bf16.msra.mxu0 %v3431_v25  ;;  %v4601_v25 = vld [vmem:[%s4718_s2] sm:$0xf] }
 0x104   :  { %v4441_v51 = vpop.f32.mrf.mxu0  ;;  %2367 = vmatprep.subr.bf16.mxu0 %v3436_v26  ;;  %2407 = vmatpush1.bf16.msra.mxu1 %v3479_v37  ;;  %v303_v26 = vsub.s32 1, %v4583_v19 }
 0x105   :  { %v4443_v29 = vpop.f32.mrf.mxu1  ;;  %2408 = vmatprep.subr.bf16.mxu1 %v3484_v33 }
 0x106   :  { %v1663_v6 = vpop.f32.mrf.mxu0 }
 0x107   :  { %v1704_v7 = vpop.f32.mrf.mxu1  ;;  %2368 = vmatpush1.bf16.msra.mxu0 %v3434_v47  ;;  %v3473_v47 = vld [vmem:[%s4717_s3 + $0x90] ss:$8 sps:$4 sm:$0xff]   ;;  %v3478_v6 = vld [vmem:[%s4717_s3 + $0x84] ss:$8 sps:$4 sm:$0xff]  }
 0x108   :  { %v1664_v17 = vpop.f32.mrf.mxu0  ;;  %2369 = vmatprep.subr.bf16.mxu0 %v3439_v30  ;;  %2409 = vmatpush1.bf16.msra.mxu1 %v3482_v35  ;;  %v3515_v30 = vld [vmem:[%s4717_s3 + $0x1b0] ss:$8 sps:$4 sm:$0xff]   ;;  %v300_v7 = vrot.slane %v4601_v25, %v299_v24  ;;  %v3518_v35 = vld [vmem:[%s4717_s3 + $0x1a0] ss:$8 sps:$4 sm:$0xff]  }
 0x109   :  { %v1705_v31 = vpop.f32.mrf.mxu1  ;;  %2410 = vmatprep.subr.bf16.mxu1 %v3487_v39  ;;  %v3476_v17 = vld [vmem:[%s4717_s3 + $0x80] ss:$8 sps:$4 sm:$0xff]  }
 0x10a   :  { %v1660_v31 = vadd.f32 %v4432_v27, %v300_v7 }
 0x10b   :  { %2370 = vmatpush1.bf16.msra.mxu0 %v3437_v16  ;;  %v304_v16 = vrot.slane %v4601_v25, %v303_v26 }
 0x10c   :  { %2371 = vmatprep.subr.bf16.mxu0 %v3442_v36  ;;  %2411 = vmatpush1.bf16.msra.mxu1 %v3485_v41  ;;  %v1701_v37 = vadd.f32 %v4434_v28, %v1660_v31  ;;  %v3523_v28 = vld [vmem:[%s4717_s3 + $0x194] ss:$8 sps:$4 sm:$0xff]  }
 0x10d   :  { %2412 = vmatprep.subr.bf16.mxu1 %v3490_v43  ;;  %v1662_v36 = vadd.f32 %v4441_v51, %v304_v16 }
 0x10f   :  { %2372 = vmatpush1.bf16.msra.mxu0 %v3440_v34 }
 0x110   :  { %2373 = vmatprep.subr.bf16.mxu0 %v3445_v38  ;;  %2413 = vmatpush1.bf16.msra.mxu1 %v3488_v45  ;;  %v1703_v38 = vadd.f32 %v4443_v29, %v1662_v36 }
 0x111   :  { %2414 = vmatprep.subr.bf16.mxu1 %v3493_v48 }
 0x113   :  { %2374 = vmatpush1.bf16.msra.mxu0 %v3443_v40 }
 0x114   :  { %2375 = vmatprep.subr.bf16.mxu0 %v3448_v42  ;;  %2415 = vmatpush1.bf16.msra.mxu1 %v3491_v50  ;;  %v3526_v50 = vld [vmem:[%s4717_s3 + $0x184] ss:$8 sps:$4 sm:$0xff]  }
 0x115   :  { %2416 = vmatprep.subr.bf16.mxu1 %v3496_v53  ;;  %v3524_v53 = vld [vmem:[%s4717_s3 + $0x180] ss:$8 sps:$4 sm:$0xff]  }
 0x117   :  { %2376 = vmatpush1.bf16.msra.mxu0 %v3446_v44  ;;  %v3521_v44 = vld [vmem:[%s4717_s3 + $0x190] ss:$8 sps:$4 sm:$0xff]  }
 0x118   :  { %2377 = vmatprep.subr.bf16.mxu0 %v3451_v46  ;;  %2417 = vmatpush1.bf16.msra.mxu1 %v3494_v55 }
 0x119   :  { %2418 = vmatprep.subr.bf16.mxu1 %v3499_v57 }
 0x11b   :  { %2378 = vmatpush1.bf16.msra.mxu0 %v3449_v49 }
 0x11c   :  { %2379 = vmatprep.subr.bf16.mxu0 %v3454_v52  ;;  %2419 = vmatpush1.bf16.msra.mxu1 %v3497_v59 }
 0x11d   :  { %2420 = vmatprep.subr.bf16.mxu1 %v3502_v61 }
 0x11f   :  { %2380 = vmatpush1.bf16.msra.mxu0 %v3452_v54 }
 0x120   :  { %2381 = vmatprep.subr.bf16.mxu0 %v3457_v56  ;;  %2421 = vmatpush1.bf16.msra.mxu1 %v3500_v63 }
 0x121   :  { %2422 = vmatprep.subr.bf16.mxu1 %v3505_v1  ;;  %v3527_v1 = vld [vmem:[%s4719_s5 + $0x78] sm:$0xff]  }
 0x123   :  { %2382 = vmatpush2.bf16.msra.mxu0 %v3455_v58 }
 0x124   :  { %2383 = vmatprep.subr.bf16.mxu0 %v3460_v60  ;;  %2423 = vmatpush2.bf16.msra.mxu1 %v3503_v3  ;;  %v3529_v3 = vld [vmem:[%s4719_s5 + $0x70] sm:$0xff]  }
 0x125   :  { %2424 = vmatprep.subr.bf16.mxu1 %v3508_v5  ;;  %v3531_v5 = vld [vmem:[%s4719_s5 + $0x68] sm:$0xff]  }
 0x127   :  { %2384 = vmatpush2.bf16.msra.mxu0 %v3458_v62 }
 0x128   :  { %2385 = vmatprep.subr.bf16.mxu0 %v3463_v0  ;;  %2425 = vmatpush2.bf16.msra.mxu1 %v3506_v9  ;;  %v3533_v9 = vld [vmem:[%s4719_s5 + $0x60] sm:$0xff]  }
 0x129   :  { %2426 = vmatprep.subr.bf16.mxu1 %v3511_v11  ;;  %v3535_v11 = vld [vmem:[%s4719_s5 + $0x58] sm:$0xff]  }
 0x12b   :  { %2386 = vmatpush2.bf16.msra.mxu0 %v3461_v2  ;;  %v3528_v2 = vld [vmem:[%s4719_s5 + $0x38] sm:$0xff]  }
 0x12c   :  { %2387 = vmatprep.subr.bf16.mxu0 %v3466_v4  ;;  %2427 = vmatpush2.bf16.msra.mxu1 %v3509_v14  ;;  %v3530_v4 = vld [vmem:[%s4719_s5 + $0x30] sm:$0xff]   ;;  %v307_v14 = vsub.s32 2, %v4583_v19 }
 0x12d   :  { %2428 = vmatprep.subr.bf16.mxu1 %v3514_v18 }
 0x12e   :  { %v308_v18 = vrot.slane %v4601_v25, %v307_v14 }
 0x12f   :  { %2388 = vmatpush2.bf16.msra.mxu0 %v3464_v8  ;;  %v3532_v8 = vld [vmem:[%s4719_s5 + $0x28] sm:$0xff]  }
 0x130   :  { %2389 = vmatprep.subr.bf16.mxu0 %v3469_v10  ;;  %2429 = vmatpush2.bf16.msra.mxu1 %v3512_v21  ;;  %v3534_v10 = vld [vmem:[%s4719_s5 + $0x20] sm:$0xff]  }
 0x131   :  { %2430 = vmatprep.subr.bf16.mxu1 %v3517_v23 }
 0x133   :  { %2390 = vmatpush2.bf16.msra.mxu0 %v3467_v13  ;;  %v3537_v13 = vld [vmem:[%s4719_s5 + $0x50] sm:$0xff]  }
 0x134   :  { %2391 = vmatprep.subr.bf16.mxu0 %v3472_v15  ;;  %2431 = vmatpush2.bf16.msra.mxu1 %v3515_v30  ;;  %v311_v15 = vsub.s32 3, %v4583_v19  ;;  %v14_v19 = vstv %s4721_s8 }
 0x135   :  { %2432 = vmatprep.subr.bf16.mxu1 %v3520_v32  ;;  %15 = vst [vmem:[#allocation2] sm:$0x1] %v14_v19 }
 0x137   :  { %2392 = vmatpush2.bf16.msra.mxu0 %v3470_v20  ;;  %v312_v20 = vrot.slane %v4601_v25, %v311_v15 }
 0x138   :  { %2393 = vmatprep.subr.bf16.mxu0 %v3475_v22  ;;  %2433 = vmatpush2.bf16.msra.mxu1 %v3518_v35 }
 0x139   :  { %2434 = vmatprep.subr.bf16.mxu1 %v3523_v28 }
 0x13b   :  { %2394 = vmatpush2.bf16.msra.mxu0 %v3473_v47 }
 0x13c   :  { %2395 = vmatprep.subr.bf16.mxu0 %v3478_v6  ;;  %2435 = vmatpush2.bf16.msra.mxu1 %v3521_v44  ;;  %v3540_v44 = vld [vmem:[%s4719_s5 + $0x8] sm:$0xff]   ;;  %v3016_v14 = vld [vmem:[#allocation2] ss:$0 sm:$0xff] }
 0x13d   :  { %2436 = vmatprep.subr.bf16.mxu1 %v3526_v50 }
 0x13f   :  { %2396 = vmatpush2.bf16.msra.mxu0 %v3476_v17 }
 0x140   :  { %2437 = vmatpush2.bf16.msra.mxu1 %v3524_v53  ;;  %3017 = vmatprep.subr.bf16.mxu0 %v3527_v1 }
 0x142   :  { %v1741_v33 = vpop.f32.mrf.mxu0 }
 0x143   :  { %v1782_v34 = vpop.f32.mrf.mxu1  ;;  %v1742_v39 = vadd.f32 %v1741_v33, %v1701_v37 }
 0x144   :  { %v1743_v27 = vpop.f32.mrf.mxu0 }
 0x145   :  { %v1784_v40 = vpop.f32.mrf.mxu1  ;;  %v1783_v51 = vadd.f32 %v1782_v34, %v1742_v39  ;;  %v1744_v41 = vadd.f32 %v1743_v27, %v1703_v38 }
 0x146   :  { %v1745_v42 = vpop.f32.mrf.mxu0 }
 0x147   :  { %v1786_v43 = vpop.f32.mrf.mxu1  ;;  %vm1953_vm0 = vcmp.gt.f32.partialorder %v1783_v51, 0.0  ;;  %v1957_v45 = vmul.f32 0.2, %v1783_v51  ;;  %v1785_v29 = vadd.f32 %v1784_v40, %v1744_v41  ;;  %v3538_v41 = vld [vmem:[%s4719_s5 + $0x10] sm:$0xff]   ;;  %v3539_v42 = vld [vmem:[%s4719_s5 + $0x48] sm:$0xff]  }
 0x148   :  { %v1746_v46 = vpop.f32.mrf.mxu0 }
 0x149   :  { %v1787_v48 = vpop.f32.mrf.mxu1  ;;  %vm1954_vm1 = vcmp.gt.f32.partialorder %v1785_v29, 0.0  ;;  %v1958_v49 = vmul.f32 0.2, %v1785_v29  ;;  %v1961_v52 = vsel %vm1953_vm0, %v1783_v51, %v1957_v45 }
 0x14a   :  { %v1965_v56 = vpack.c.bf16 %v1961_v52, %v1961_v52  ;;  %v3542_v48 = vld [vmem:[%s4719_s5] sm:$0xff]  }
 0x14b   :  { %v1962_v54 = vsel %vm1954_vm1, %v1785_v29, %v1958_v49  ;;  %v3541_v29 = vld [vmem:[%s4719_s5 + $0x40] sm:$0xff]  }
 0x14c   :  { %v1966_v55 = vpack.c.bf16 %v1962_v54, %v1962_v54  ;;  %v2033_v49 = vld [vmem:[%s4720_s4] sm:$0x3] }
 0x14d   :  { %v2038_v50 = vrot.slane %v2033_v49, %v299_v24  ;;  %v2042_v52 = vrot.slane %v2033_v49, %v303_v26  ;;  %v2998_v26 = vld [vmem:[%s4722_s6] ss:$0 sm:$0xff] }
 0x14e   :  { %2397 = vmatprep.mubr.bf16.mxu0 %v1966_v55 }
 0x14f   :  { %2398 = vmatmul.mubr.bf16.vlgmr.msra.gmra.mxu0 %v1965_v56 }
 0x150   :  { %3018 = vmatpush3.bf16.msra.mxu0 %v3528_v2 }
 0x151   :  { %3019 = vmatprep.subr.bf16.mxu0 %v3529_v3 }
 0x154   :  { %3020 = vmatpush3.bf16.msra.mxu0 %v3530_v4 }
 0x155   :  { %3021 = vmatprep.subr.bf16.mxu0 %v3531_v5 }
 0x158   :  { %3022 = vmatpush3.bf16.msra.mxu0 %v3532_v8 }
 0x159   :  { %3023 = vmatprep.subr.bf16.mxu0 %v3533_v9 }
 0x15c   :  { %3024 = vmatpush3.bf16.msra.mxu0 %v3534_v10 }
 0x15d   :  { %3025 = vmatprep.subr.bf16.mxu0 %v3535_v11  ;;  %v3015_v11 = vld [vmem:[%s4723_s7] ss:$0 sm:$0xff] }
 0x160   :  { %3026 = vmatpush3.bf16.msra.mxu0 %v3536_v12 }
 0x161   :  { %3027 = vmatprep.subr.bf16.mxu0 %v3537_v13 }
 0x164   :  { %3028 = vmatpush3.bf16.msra.mxu0 %v3538_v41 }
 0x165   :  { %3029 = vmatprep.subr.bf16.mxu0 %v3539_v42 }
 0x168   :  { %3030 = vmatpush3.bf16.msra.mxu0 %v3540_v44 }
 0x169   :  { %3031 = vmatprep.subr.bf16.mxu0 %v3541_v29 }
 0x16c   :  { %3032 = vmatpush3.bf16.msra.mxu0 %v3542_v48 }
 0x182   :  { %v1823_v57 = vpop.f32.mrf.mxu0 }
 0x183   :  { %v1864_v58 = vpop.f32.mrf.mxu1  ;;  %v1824_v21 = vadd.f32 %v1823_v57, %v308_v18 }
 0x184   :  { %v1825_v59 = vpop.f32.mrf.mxu0 }
 0x185   :  { %v1866_v60 = vpop.f32.mrf.mxu1  ;;  %v1826_v22 = vadd.f32 %v1825_v59, %v312_v20  ;;  %v1865_v23 = vadd.f32 %v1864_v58, %v1824_v21 }
 0x186   :  { %v1827_v61 = vpop.f32.mrf.mxu0 }
 0x187   :  { %v1868_v62 = vpop.f32.mrf.mxu1  ;;  %v1867_v6 = vadd.f32 %v1866_v60, %v1826_v22 }
 0x188   :  { %v1828_v63 = vpop.f32.mrf.mxu0 }
 0x189   :  { %v1869_v0 = vpop.f32.mrf.mxu1 }
 0x1c2   :  { %v1905_v47 = vpop.f32.mrf.mxu0 }
 0x1c3   :  { %v1946_v30 = vpop.f32.mrf.mxu1  ;;  %v1906_v7 = vadd.f32 %v1905_v47, %v1865_v23 }
 0x1c4   :  { %v1907_v16 = vpop.f32.mrf.mxu0 }
 0x1c5   :  { %v1948_v17 = vpop.f32.mrf.mxu1  ;;  %v1947_v31 = vadd.f32 %v1946_v30, %v1906_v7  ;;  %v1908_v36 = vadd.f32 %v1907_v16, %v1867_v6 }
 0x1c6   :  { %v1909_v37 = vpop.f32.mrf.mxu0 }
 0x1c7   :  { %v1950_v32 = vpop.f32.mrf.mxu1  ;;  %vm1955_vm2 = vcmp.gt.f32.partialorder %v1947_v31, 0.0  ;;  %v1959_v33 = vmul.f32 0.2, %v1947_v31  ;;  %v1949_v34 = vadd.f32 %v1948_v17, %v1908_v36 }
 0x1c8   :  { %v1910_v35 = vpop.f32.mrf.mxu0 }
 0x1c9   :  { %v1951_v38 = vpop.f32.mrf.mxu1  ;;  %vm1956_vm3 = vcmp.gt.f32.partialorder %v1949_v34, 0.0  ;;  %v1960_v25 = vmul.f32 0.2, %v1949_v34  ;;  %v1963_v39 = vsel %vm1955_vm2, %v1947_v31, %v1959_v33 }
 0x1ca   :  { %v1967_v51 = vpack.c.bf16 %v1963_v39, %v1963_v39 }
 0x1cb   :  { %v1964_v27 = vsel %vm1956_vm3, %v1949_v34, %v1960_v25 }
 0x1cc   :  { %v1968_v40 = vpack.c.bf16 %v1964_v27, %v1964_v27 }
 0x1ce   :  { %2438 = vmatprep.mubr.bf16.mxu1 %v1968_v40 }
 0x1cf   :  { %2439 = vmatmul.mubr.bf16.vlgmr.msra.gmra.mxu1 %v1967_v51 }
 0x20f   :  { %v2399_v28 = vpop.f32.mrf.mxu0 }
 0x210   :  { %v2400_v53 = vadd.f32 %v2399_v28, %v2038_v50 }
 0x211   :  { %v2401_v43 = vpop.f32.mrf.mxu0 }
 0x212   :  { %v2402_v55 = vadd.f32 %v2401_v43, %v2042_v52 }
 0x213   :  { %v2403_v45 = vpop.f32.mrf.mxu0 }
 0x215   :  { %v2404_v46 = vpop.f32.mrf.mxu0 }
 0x28f   :  { %v2440_v54 = vpop.f32.mrf.mxu1 }
 0x290   :  { %v2441_v56 = vadd.f32 %v2440_v54, %v2400_v53 }
 0x291   :  { %v2442_v57 = vpop.f32.mrf.mxu1 }
 0x292   :  { %vm2447_vm4 = vcmp.gt.f32.partialorder %v2441_v56, 0.0  ;;  %v2449_v58 = vmul.f32 0.2, %v2441_v56  ;;  %v2443_v59 = vadd.f32 %v2442_v57, %v2402_v55 }
 0x293   :  { %v2444_v60 = vpop.f32.mrf.mxu1 }
 0x294   :  { %vm2448_vm5 = vcmp.gt.f32.partialorder %v2443_v59, 0.0  ;;  %v2450_v61 = vmul.f32 0.2, %v2443_v59  ;;  %v2451_v62 = vsel %vm2447_vm4, %v2441_v56, %v2449_v58 }
 0x295   :  { %v2445_v63 = vpop.f32.mrf.mxu1  ;;  %v2453_v2 = vpack.c.bf16 %v2451_v62, %v2451_v62 }
 0x296   :  { %v2452_v0 = vsel %vm2448_vm5, %v2443_v59, %v2450_v61 }
 0x297   :  { %v2454_v1 = vpack.c.bf16 %v2452_v0, %v2452_v0 }
 0x299   :  { %2622 = vmatprep.mubr.bf16.mxu0 %v2454_v1 }
 0x29a   :  { %2623 = vmatmul.mubr.bf16.vlgmr.msra.gmra.mxu0 %v2453_v2 }
 0x35a   :  { %v3033_v24 = vpop.f32.mrf.mxu0 }
 0x35c   :  { %v3034_v3 = vpop.f32.mrf.mxu0 }
 0x35d   :  { %v3035_v4 = vadd.f32 %v3034_v3, %v3033_v24 }
 0x35e   :  { %v3036_v5 = vpop.f32.mrf.mxu0 }
 0x35f   :  { %v2625_v8 = vadd.f32 %v3035_v4, %v2998_v26 }
 0x360   :  { %v3037_v9 = vpop.f32.mrf.mxu0 }
 0x361   :  { %vm2630_vm6 = vcmp.gt.f32.partialorder %v2625_v8, 0.0  ;;  %v2631_v10 = vmul.f32 0.2, %v2625_v8 }
 0x363   :  { %v2632_v12 = vsel %vm2630_vm6, %v2625_v8, %v2631_v10 }
 0x364   :  { %v2640_v13 = vmul.f32 %v3015_v11, %v2632_v12 }
 0x366   :  { %2641 = vadd.xlane.f32.xlu0 %v2640_v13 }
 0x3ef   :  { %v2642_v15 = vpop.xlane.xlu0 %2641 }
 0x3f0   :  { %v2650_v18 = vadd.f32 %v3016_v14, %v2642_v15 }
 0x3f2   :  { %v2652_v20 = vsub.f32 0.0, %v2650_v18  ;;  %v2658_v21 = vmul.f32 1.442695, %v2650_v18  ;;  %vm2651_vm8 = vcmp.ge.f32.partialorder %v2650_v18, 0.0 }
 0x3f4   :  { %v2653_v22 = vmul.f32 1.442695, %v2652_v20  ;;  %3543 = vpow2.f32 %v2658_v21 }
 0x3f6   :  { %3545 = vpow2.f32 %v2653_v22 }
 0x401   :  { %v3544_v23 = vpop.eup %3543 }
 0x402   :  { %v2660_v47 = vadd.f32 1.0, %v3544_v23 }
 0x403   :  { %v3546_v30 = vpop.eup %3545 }
 0x404   :  { %v2655_v6 = vadd.f32 1.0, %v3546_v30  ;;  %3547 = vrcp.f32 %v2660_v47 }
 0x406   :  { %3549 = vrcp.f32 %v2655_v6 }
 0x411   :  { %v3548_v7 = vpop.eup %3547 }
 0x412   :  { %v2662_v16 = vmul.f32 %v3548_v7, %v3544_v23 }
 0x413   :  { %v3550_v17 = vpop.eup %3549 }
 0x414   :  { %v2663_v31 = vsel %vm2651_vm8, %v3550_v17, %v2662_v16 }
 0x415   :  { %2665 = vst.msk [vmem:[%s4724_s9] sm:$0xff] %vm2664_vm7, %v2663_v31 }

</bundles_post_ra>
